<compile_context>
chip_gen: v7x
topology: tpu7x:2x2x1
jax: 0.10.0
libtpu: 0.0.40
codegen_flags: <defaults>
</compile_context>

<pallas_src>
import functools

import jax
import jax.numpy as jnp
from jax.experimental import pallas as pl
from jax.experimental.pallas import tpu as pltpu

INPUT_DIM = 2
HIDDEN_DIM = 64
LATENT_DIM = 2

IN_W = INPUT_DIM + LATENT_DIM            # packed input width  (x | eps)
OUT_W = INPUT_DIM + 2 * LATENT_DIM       # packed output width (x_rec | z_mean | z_log_var)

# ----------------------------------------------------------------------------
# Packed-parameter layout: every weight/bias lives in one (PACK_ROWS, 128) slab.
# Row offsets are 8-aligned so in-kernel static slices never straddle sublane
# tiles (no hidden VMEM copies).
# ----------------------------------------------------------------------------
_LAYER_DIMS = [
    ("enc1", INPUT_DIM, HIDDEN_DIM),            # encoder Linear 1
    ("enc2", HIDDEN_DIM, HIDDEN_DIM // 2),      # encoder Linear 2
    ("head", HIDDEN_DIM // 2, 2 * LATENT_DIM),  # fused z_mean | z_log_var
    ("dec1", LATENT_DIM, HIDDEN_DIM // 2),      # decoder Linear 1
    ("dec2", HIDDEN_DIM // 2, HIDDEN_DIM),      # decoder Linear 2
    ("dec3", HIDDEN_DIM, INPUT_DIM),            # decoder Linear 3
]


def _round8(v):
    return ((v + 7) // 8) * 8


def _build_layout():
    layout = {}
    off = 0
    for name, fan_in, fan_out in _LAYER_DIMS:
        w_off = off
        off += _round8(fan_in)
        b_off = off
        off += 8
        layout[name] = (w_off, b_off, fan_in, fan_out)
    return layout, off


_LAYOUT, _PACK_ROWS = _build_layout()   # _PACK_ROWS == 256
_PACK_COLS = 128


def init_params(key, input_dim=INPUT_DIM, hidden_dim=HIDDEN_DIM,
                latent_dim=LATENT_DIM, dtype=jnp.float32):
    """Deterministic synthetic parameters (PyTorch-equivalent shapes, stored transposed)."""
    dims = [
        (input_dim, hidden_dim),          # encoder Linear 1
        (hidden_dim, hidden_dim // 2),    # encoder Linear 2
        (hidden_dim // 2, latent_dim),    # z_mean
        (hidden_dim // 2, latent_dim),    # z_log_var
        (latent_dim, hidden_dim // 2),    # decoder Linear 1
        (hidden_dim // 2, hidden_dim),    # decoder Linear 2
        (hidden_dim, input_dim),          # decoder Linear 3
    ]
    params = []
    keys = jax.random.split(key, len(dims))
    for k, (fan_in, fan_out) in zip(keys, dims):
        kw, kb = jax.random.split(k)
        bound = 1.0 / jnp.sqrt(fan_in)
        w = jax.random.uniform(kw, (fan_in, fan_out), dtype, -bound, bound)
        b = jax.random.uniform(kb, (1, fan_out), dtype, -bound, bound)
        params.append((w, b))
    return params


def pack_params(params):
    """Pack all weights/biases (with fused latent heads) into one (PACK_ROWS, 128) slab."""
    (w1, b1), (w2, b2), (wm, bm), (wv, bv), (wd1, bd1), (wd2, bd2), (wd3, bd3) = params
    wh = jnp.concatenate([wm, wv], axis=1)                        # (32, 2*latent)
    bh = jnp.concatenate([bm.reshape(1, -1), bv.reshape(1, -1)], axis=1)
    layer_params = [(w1, b1), (w2, b2), (wh, bh), (wd1, bd1), (wd2, bd2), (wd3, bd3)]

    packed = jnp.zeros((_PACK_ROWS, _PACK_COLS), jnp.float32)
    for (name, fan_in, fan_out), (w, b) in zip(_LAYER_DIMS, layer_params):
        w_off, b_off, _, _ = _LAYOUT[name]
        packed = packed.at[w_off:w_off + fan_in, :fan_out].set(w.astype(jnp.float32))
        packed = packed.at[b_off, :fan_out].set(b.reshape(-1).astype(jnp.float32))
    return packed


# ----------------------------------------------------------------------------
# Kernel
# ----------------------------------------------------------------------------
def _vae_kernel(xin_ref, p_ref, out_ref):
    xe = xin_ref[...].astype(jnp.float32)
    x = xe[:, 0:INPUT_DIM]
    eps = xe[:, INPUT_DIM:INPUT_DIM + LATENT_DIM]

    def wslab(name):
        w_off, b_off, fan_in, fan_out = _LAYOUT[name]
        w = p_ref[w_off:w_off + fan_in, 0:fan_out]     # static, 8-aligned slice
        b = p_ref[b_off:b_off + 1, 0:fan_out]          # (1, fan_out) row
        return w, b

    # encoder L1: K=2 -> rank-1 VPU expansion (skip a 98%-padded MXU contraction)
    w1, b1 = wslab("enc1")
    h = x[:, 0:1] * w1[0:1, :] + x[:, 1:2] * w1[1:2, :] + b1
    h = jnp.maximum(h, 0.0)

    # encoder L2 (K=64) on the MXU
    w2, b2 = wslab("enc2")
    h = jnp.maximum(jnp.dot(h, w2, preferred_element_type=jnp.float32) + b2, 0.0)

    # fused latent heads: one (32 -> 2*latent) matmul, then slice
    wh, bh = wslab("head")
    zz = jnp.dot(h, wh, preferred_element_type=jnp.float32) + bh
    z_mean = zz[:, 0:LATENT_DIM]
    z_log_var = zz[:, LATENT_DIM:2 * LATENT_DIM]

    # reparameterize: z = mean + eps * exp(0.5 * log_var)   (exp -> EUP, free slot)
    z = z_mean + eps * jnp.exp(0.5 * z_log_var)

    # decoder L1: K=2 -> rank-1 VPU expansion
    wd1, bd1 = wslab("dec1")
    d = z[:, 0:1] * wd1[0:1, :] + z[:, 1:2] * wd1[1:2, :] + bd1
    d = jnp.maximum(d, 0.0)

    # decoder L2 / L3 on the MXU
    wd2, bd2 = wslab("dec2")
    d = jnp.maximum(jnp.dot(d, wd2, preferred_element_type=jnp.float32) + bd2, 0.0)

    wd3, bd3 = wslab("dec3")
    x_rec = jnp.dot(d, wd3, preferred_element_type=jnp.float32) + bd3

    # single lane-packed output slab: [x_rec | z_mean | z_log_var] -> one store stream
    out_ref[...] = jnp.concatenate([x_rec, z_mean, z_log_var], axis=1).astype(out_ref.dtype)


# ----------------------------------------------------------------------------
# Wrapper
# ----------------------------------------------------------------------------
@functools.partial(jax.jit, static_argnames=("block_batch",))
def vae_forward(x, eps, packed_params, block_batch=256):
    """Full VAE forward in one Pallas kernel, tiled over the batch dimension."""
    n, in_dim = x.shape
    assert in_dim == INPUT_DIM

    grid_n = pl.cdiv(n, block_batch)
    n_pad = grid_n * block_batch

    xin = jnp.concatenate([x, eps], axis=1)            # (n, 4) packed input stream
    if n_pad != n:
        xin = jnp.pad(xin, ((0, n_pad - n), (0, 0)))

    out = pl.pallas_call(
        _vae_kernel,
        out_shape=jax.ShapeDtypeStruct((n_pad, OUT_W), x.dtype),
        grid=(grid_n,),
        in_specs=[
            pl.BlockSpec((block_batch, IN_W), lambda i: (i, 0)),
            pl.BlockSpec((_PACK_ROWS, _PACK_COLS), lambda i: (0, 0)),   # resident weights
        ],
        out_specs=pl.BlockSpec((block_batch, OUT_W), lambda i: (i, 0)),
        compiler_params=pltpu.CompilerParams(
            dimension_semantics=("parallel",)),
    )(xin, packed_params)

    out = out[:n]
    x_rec = out[:, 0:INPUT_DIM]
    z_mean = out[:, INPUT_DIM:INPUT_DIM + LATENT_DIM]
    z_log_var = out[:, INPUT_DIM + LATENT_DIM:OUT_W]
    return x_rec, z_mean, z_log_var


def vae_forward_ref(x, eps, params):
    """Pure-JAX reference for sanity checking."""
    (w1, b1), (w2, b2), (wm, bm), (wv, bv), (wd1, bd1), (wd2, bd2), (wd3, bd3) = params
    h = jnp.maximum(x @ w1 + b1, 0.0)
    h = jnp.maximum(h @ w2 + b2, 0.0)
    z_mean = h @ wm + bm
    z_log_var = h @ wv + bv
    z = z_mean + eps * jnp.exp(0.5 * z_log_var)
    d = jnp.maximum(z @ wd1 + bd1, 0.0)
    d = jnp.maximum(d @ wd2 + bd2, 0.0)
    x_rec = d @ wd3 + bd3
    return x_rec, z_mean, z_log_var


if __name__ == "__main__":
    key = jax.random.PRNGKey(0)
    k_param, k_x, k_eps = jax.random.split(key, 3)

    batch = 512           # 2 grid steps at block_batch=256 -> shards across v7x's 2 TCs
    block_batch = 256

    params = init_params(k_param)
    packed = pack_params(params)

    x = jax.random.normal(k_x, (batch, INPUT_DIM), jnp.float32)
    # TODO(synk): torch.randn_like is sampled host-side as an explicit eps input
    # (deterministic stand-in); could be moved in-kernel with pltpu.prng_* if needed.
    eps = jax.random.normal(k_eps, (batch, LATENT_DIM), jnp.float32)

    x_rec, z_mean, z_log_var = vae_forward(x, eps, packed, block_batch=block_batch)
    jax.block_until_ready((x_rec, z_mean, z_log_var))

    # sanity check against pure-JAX reference
    r_rec, r_mean, r_lv = vae_forward_ref(x, eps, params)
    assert jnp.allclose(x_rec, r_rec, atol=1e-5, rtol=1e-5)
    assert jnp.allclose(z_mean, r_mean, atol=1e-5, rtol=1e-5)
    assert jnp.allclose(z_log_var, r_lv, atol=1e-5, rtol=1e-5)

    print("KERNEL_OK")
</pallas_src>

<mosaic_0001>
module attributes {stable_mosaic.version = 11 : i64} {
  func.func @_vae_kernel(%arg0: i32, %arg1: memref<256x4xf32, #tpu.memory_space<vmem>>, %arg2: memref<256x128xf32, #tpu.memory_space<vmem>>, %arg3: memref<256x6xf32, #tpu.memory_space<vmem>>) attributes {dimension_semantics = [#tpu.dimension_semantics<parallel>], iteration_bounds = array<i64: 2>, scalar_prefetch = 0 : i64, scratch_operands = 0 : i64, tpu.core_type = #tpu.core_type<tc>, window_params = [{transform_indices = @transform_0, window_bounds = array<i64: 256, 4>}, {pipeline_mode = #tpu.pipeline_mode<synchronous>, transform_indices = @transform_1, window_bounds = array<i64: 256, 128>}, {transform_indices = @transform_2, window_bounds = array<i64: 256, 6>}]} {
    %c0 = arith.constant 0 : index
    %c0_0 = arith.constant 0 : index
    %0 = vector.load %arg1[%c0, %c0_0] : memref<256x4xf32, #tpu.memory_space<vmem>>, vector<256x4xf32>
    %1 = vector.extract_strided_slice %0 {offsets = [0, 0], sizes = [256, 2], strides = [1, 1]} : vector<256x4xf32> to vector<256x2xf32>
    %2 = vector.extract_strided_slice %0 {offsets = [0, 2], sizes = [256, 2], strides = [1, 1]} : vector<256x4xf32> to vector<256x2xf32>
    %c0_1 = arith.constant 0 : index
    %c0_2 = arith.constant 0 : index
    %3 = vector.load %arg2[%c0_1, %c0_2] : memref<256x128xf32, #tpu.memory_space<vmem>>, vector<2x64xf32>
    %c8 = arith.constant 8 : index
    %c0_3 = arith.constant 0 : index
    %4 = vector.load %arg2[%c8, %c0_3] : memref<256x128xf32, #tpu.memory_space<vmem>>, vector<1x64xf32>
    %5 = vector.extract_strided_slice %1 {offsets = [0, 0], sizes = [256, 1], strides = [1, 1]} : vector<256x2xf32> to vector<256x1xf32>
    %6 = vector.extract_strided_slice %3 {offsets = [0, 0], sizes = [1, 64], strides = [1, 1]} : vector<2x64xf32> to vector<1x64xf32>
    %7 = vector.broadcast %5 : vector<256x1xf32> to vector<256x64xf32>
    %8 = vector.broadcast %6 : vector<1x64xf32> to vector<256x64xf32>
    %9 = arith.mulf %7, %8 : vector<256x64xf32>
    %10 = vector.extract_strided_slice %1 {offsets = [0, 1], sizes = [256, 1], strides = [1, 1]} : vector<256x2xf32> to vector<256x1xf32>
    %11 = vector.extract_strided_slice %3 {offsets = [1, 0], sizes = [1, 64], strides = [1, 1]} : vector<2x64xf32> to vector<1x64xf32>
    %12 = vector.broadcast %10 : vector<256x1xf32> to vector<256x64xf32>
    %13 = vector.broadcast %11 : vector<1x64xf32> to vector<256x64xf32>
    %14 = arith.mulf %12, %13 : vector<256x64xf32>
    %15 = arith.addf %9, %14 : vector<256x64xf32>
    %16 = vector.broadcast %4 : vector<1x64xf32> to vector<256x64xf32>
    %17 = arith.addf %15, %16 : vector<256x64xf32>
    %cst = arith.constant 0.000000e+00 : f32
    %18 = vector.broadcast %cst : f32 to vector<256x64xf32>
    %19 = arith.maximumf %17, %18 : vector<256x64xf32>
    %c16 = arith.constant 16 : index
    %c0_4 = arith.constant 0 : index
    %20 = vector.load %arg2[%c16, %c0_4] : memref<256x128xf32, #tpu.memory_space<vmem>>, vector<64x32xf32>
    %c80 = arith.constant 80 : index
    %c0_5 = arith.constant 0 : index
    %21 = vector.load %arg2[%c80, %c0_5] : memref<256x128xf32, #tpu.memory_space<vmem>>, vector<1x32xf32>
    %cst_6 = arith.constant dense<0.000000e+00> : vector<256x32xf32>
    %22 = tpu.matmul %19, %20, %cst_6 {dimension_numbers = #tpu.dot_dimension_numbers<[1], [0], [0], [1], [0, 0, 1, 1], [], []>} : vector<256x64xf32>, vector<64x32xf32>, vector<256x32xf32> -> vector<256x32xf32>
    %23 = vector.broadcast %21 : vector<1x32xf32> to vector<256x32xf32>
    %24 = arith.addf %22, %23 : vector<256x32xf32>
    %cst_7 = arith.constant 0.000000e+00 : f32
    %25 = vector.broadcast %cst_7 : f32 to vector<256x32xf32>
    %26 = arith.maximumf %24, %25 : vector<256x32xf32>
    %c88 = arith.constant 88 : index
    %c0_8 = arith.constant 0 : index
    %27 = vector.load %arg2[%c88, %c0_8] : memref<256x128xf32, #tpu.memory_space<vmem>>, vector<32x4xf32>
    %c120 = arith.constant 120 : index
    %c0_9 = arith.constant 0 : index
    %28 = vector.load %arg2[%c120, %c0_9] : memref<256x128xf32, #tpu.memory_space<vmem>>, vector<1x4xf32>
    %cst_10 = arith.constant dense<0.000000e+00> : vector<256x4xf32>
    %29 = tpu.matmul %26, %27, %cst_10 {dimension_numbers = #tpu.dot_dimension_numbers<[1], [0], [0], [1], [0, 0, 1, 1], [], []>} : vector<256x32xf32>, vector<32x4xf32>, vector<256x4xf32> -> vector<256x4xf32>
    %30 = vector.broadcast %28 : vector<1x4xf32> to vector<256x4xf32>
    %31 = arith.addf %29, %30 : vector<256x4xf32>
    %32 = vector.extract_strided_slice %31 {offsets = [0, 0], sizes = [256, 2], strides = [1, 1]} : vector<256x4xf32> to vector<256x2xf32>
    %33 = vector.extract_strided_slice %31 {offsets = [0, 2], sizes = [256, 2], strides = [1, 1]} : vector<256x4xf32> to vector<256x2xf32>
    %cst_11 = arith.constant 5.000000e-01 : f32
    %34 = vector.broadcast %cst_11 : f32 to vector<256x2xf32>
    %35 = arith.mulf %34, %33 : vector<256x2xf32>
    %36 = math.exp %35 : vector<256x2xf32>
    %37 = arith.mulf %2, %36 : vector<256x2xf32>
    %38 = arith.addf %32, %37 : vector<256x2xf32>
    %c128 = arith.constant 128 : index
    %c0_12 = arith.constant 0 : index
    %39 = vector.load %arg2[%c128, %c0_12] : memref<256x128xf32, #tpu.memory_space<vmem>>, vector<2x32xf32>
    %c136 = arith.constant 136 : index
    %c0_13 = arith.constant 0 : index
    %40 = vector.load %arg2[%c136, %c0_13] : memref<256x128xf32, #tpu.memory_space<vmem>>, vector<1x32xf32>
    %41 = vector.extract_strided_slice %38 {offsets = [0, 0], sizes = [256, 1], strides = [1, 1]} : vector<256x2xf32> to vector<256x1xf32>
    %42 = vector.extract_strided_slice %39 {offsets = [0, 0], sizes = [1, 32], strides = [1, 1]} : vector<2x32xf32> to vector<1x32xf32>
    %43 = vector.broadcast %41 : vector<256x1xf32> to vector<256x32xf32>
    %44 = vector.broadcast %42 : vector<1x32xf32> to vector<256x32xf32>
    %45 = arith.mulf %43, %44 : vector<256x32xf32>
    %46 = vector.extract_strided_slice %38 {offsets = [0, 1], sizes = [256, 1], strides = [1, 1]} : vector<256x2xf32> to vector<256x1xf32>
    %47 = vector.extract_strided_slice %39 {offsets = [1, 0], sizes = [1, 32], strides = [1, 1]} : vector<2x32xf32> to vector<1x32xf32>
    %48 = vector.broadcast %46 : vector<256x1xf32> to vector<256x32xf32>
    %49 = vector.broadcast %47 : vector<1x32xf32> to vector<256x32xf32>
    %50 = arith.mulf %48, %49 : vector<256x32xf32>
    %51 = arith.addf %45, %50 : vector<256x32xf32>
    %52 = vector.broadcast %40 : vector<1x32xf32> to vector<256x32xf32>
    %53 = arith.addf %51, %52 : vector<256x32xf32>
    %cst_14 = arith.constant 0.000000e+00 : f32
    %54 = vector.broadcast %cst_14 : f32 to vector<256x32xf32>
    %55 = arith.maximumf %53, %54 : vector<256x32xf32>
    %c144 = arith.constant 144 : index
    %c0_15 = arith.constant 0 : index
    %56 = vector.load %arg2[%c144, %c0_15] : memref<256x128xf32, #tpu.memory_space<vmem>>, vector<32x64xf32>
    %c176 = arith.constant 176 : index
    %c0_16 = arith.constant 0 : index
    %57 = vector.load %arg2[%c176, %c0_16] : memref<256x128xf32, #tpu.memory_space<vmem>>, vector<1x64xf32>
    %cst_17 = arith.constant dense<0.000000e+00> : vector<256x64xf32>
    %58 = tpu.matmul %55, %56, %cst_17 {dimension_numbers = #tpu.dot_dimension_numbers<[1], [0], [0], [1], [0, 0, 1, 1], [], []>} : vector<256x32xf32>, vector<32x64xf32>, vector<256x64xf32> -> vector<256x64xf32>
    %59 = vector.broadcast %57 : vector<1x64xf32> to vector<256x64xf32>
    %60 = arith.addf %58, %59 : vector<256x64xf32>
    %cst_18 = arith.constant 0.000000e+00 : f32
    %61 = vector.broadcast %cst_18 : f32 to vector<256x64xf32>
    %62 = arith.maximumf %60, %61 : vector<256x64xf32>
    %c184 = arith.constant 184 : index
    %c0_19 = arith.constant 0 : index
    %63 = vector.load %arg2[%c184, %c0_19] : memref<256x128xf32, #tpu.memory_space<vmem>>, vector<64x2xf32>
    %c248 = arith.constant 248 : index
    %c0_20 = arith.constant 0 : index
    %64 = vector.load %arg2[%c248, %c0_20] : memref<256x128xf32, #tpu.memory_space<vmem>>, vector<1x2xf32>
    %cst_21 = arith.constant dense<0.000000e+00> : vector<256x2xf32>
    %65 = tpu.matmul %62, %63, %cst_21 {dimension_numbers = #tpu.dot_dimension_numbers<[1], [0], [0], [1], [0, 0, 1, 1], [], []>} : vector<256x64xf32>, vector<64x2xf32>, vector<256x2xf32> -> vector<256x2xf32>
    %66 = vector.broadcast %64 : vector<1x2xf32> to vector<256x2xf32>
    %67 = arith.addf %65, %66 : vector<256x2xf32>
    %68 = tpu.concatenate %67, %32, %33 in 1 : vector<256x2xf32>, vector<256x2xf32>, vector<256x2xf32> -> vector<256x6xf32>
    %c0_22 = arith.constant 0 : index
    %c0_23 = arith.constant 0 : index
    %69 = vector.load %arg3[%c0_22, %c0_23] : memref<256x6xf32, #tpu.memory_space<vmem>>, vector<256x6xf32>
    tpu.vector_store %arg3[%c0_22, %c0_23], %68 {strides = array<i32>} : memref<256x6xf32, #tpu.memory_space<vmem>>, vector<256x6xf32>,
    return
  }
  func.func @transform_0(%arg0: i32) -> (i32, i32) {
    %c0_i32 = arith.constant 0 : i32
    %c0_i32_0 = arith.constant 0 : i32
    return %arg0, %c0_i32 : i32, i32
  }
  func.func @transform_1(%arg0: i32) -> (i32, i32) {
    %c0_i32 = arith.constant 0 : i32
    %c0_i32_0 = arith.constant 0 : i32
    %c0_i32_1 = arith.constant 0 : i32
    return %c0_i32, %c0_i32_0 : i32, i32
  }
  func.func @transform_2(%arg0: i32) -> (i32, i32) {
    %c0_i32 = arith.constant 0 : i32
    %c0_i32_0 = arith.constant 0 : i32
    return %arg0, %c0_i32 : i32, i32
  }
}

</mosaic_0001>

<bundles_post_ra>
// kernel: vae_forward.1
= control target key start
LH: loop header
LB: loop body
LE: loop exit
PB: predicated region body
PF: predicated region fallthrough
CT: control target
= control target key end

     0   :  { %s3804_s9 = smov 0   ;;  %s4832_s0 = inlined_call_operand.vmem [shape: f32[512,4], index: 0, kind: input, shape index: {}]   ;;  %s4833_s1 = inlined_call_operand.vmem [shape: f32[256,128], index: 1, kind: input, shape index: {}]   ;;  %s4834_s2 = inlined_call_operand.vmem [shape: f32[512,6], index: 2, kind: output, shape index: {}]  }
   0x1 LB: > { %s3068_s10 = sadd.s32 4294967295, %s3783_s9   ;;  %p3072_p0 = scmp.ge.s32.totalorder %s3783_s9, 1  ;;  %s3783_s9 = sphi %s3804_s9, %s12_s9  }
   0x2   : > { %p113_p1 = scmp.lt.s32.totalorder %s3783_s9, 3 }
   0x4   : > { %p114_p2 = pnand %p3072_p0, %p113_p1 }
   0x5   : > { %s3073_s11 = sshll.u32 (!%p114_p2), %s3068_s10, 5  ;;  %v3785_v0 = vmov (!%p114_p2), 0   ;;  %v641_v1 = vld [vmem:[%s4833_s1 + $0x10] sm:$0xff] (!%p114_p2)  ;;  %v642_v2 = vld [vmem:[%s4833_s1 + $0x18] sm:$0xff] (!%p114_p2)  ;;  %v3786_v6 = vmov (!%p114_p2), 1   ;;  %v643_v8 = vld [vmem:[%s4833_s1 + $0x20] sm:$0xff] (!%p114_p2)  ;;  %v341_v44 = vlaneseq (!%p114_p2) }
   0x6   : > { %117 = sbr.rel (%p114_p2) target bundleno = 1432 (0x598), region = 28  ;;  %3675 = vset.pattern.permute.xlu1 (!%p114_p2), %v3785_v0  ;;  %3673 = vset.pattern.permute.xlu0 (!%p114_p2), %v3785_v0  ;;  %p136_p3 = scmp.lt.s32.totalorder (!%p114_p2), %s3073_s11, 63  ;;  %v3605_v3 = vpack.c.bf16 (!%p114_p2), %v642_v2, %v641_v1  ;;  %v644_v10 = vld [vmem:[%s4833_s1 + $0x28] sm:$0xff] (!%p114_p2)  ;;  %v645_v11 = vld [vmem:[%s4833_s1 + $0x30] sm:$0xff] (!%p114_p2)  ;;  %v646_v13 = vld [vmem:[%s4833_s1 + $0x38] sm:$0xff] (!%p114_p2)  ;;  %vm654_vm0 = vcmask (!%p114_p2), 523264  }
   0x7   : > { %v3609_v12 = vpack.c.bf16 (!%p114_p2), %v644_v10, %v643_v8  ;;  %v3613_v14 = vpack.c.bf16 (!%p114_p2), %v646_v13, %v645_v11  ;;  %v647_v15 = vld [vmem:[%s4833_s1 + $0x40] sm:$0xff] (!%p114_p2)  ;;  %v648_v16 = vld [vmem:[%s4833_s1 + $0x48] sm:$0xff] (!%p114_p2)  ;;  %v3882_v46 = vshrl.u32 (!%p114_p2), %v341_v44, 7  ;;  %v1008_v62 = vld [vmem:[%s4833_s1 + $0x58] sm:$0xff] (!%p114_p2)  ;;  %vm1017_vm1 = vcmask (!%p114_p2), 261120   ;;  %s3787_s24 = smov (!%p114_p2), 126  }
   0x8   : > { %3606 = vmatprep.subr.bf16.mxu0 (!%p114_p2), %v3605_v3  ;;  %v3617_v18 = vpack.c.bf16 (!%p114_p2), %v648_v16, %v647_v15  ;;  %v179_v50 = vld [vmem:[%s4833_s1] sm:$0x3] (!%p114_p2)  ;;  %v3907_v61 = vld [vmem:[%s4833_s1 + $0x8] ss:$0 sm:$0xff] (!%p114_p2)  ;;  %s3788_s4 = smov (!%p114_p2), 2   ;;  %vm2913_vm2 = vcmask (!%p114_p2), 15360  }
   0x9   : > { %3608 = vmatpush3.bf16.msra.mxu0 (!%p114_p2), %v3605_v3  ;;  %v343_v48 = vsub.s32 (!%p114_p2), 0, %v3882_v46  ;;  %v507_v49 = vsub.s32 (!%p114_p2), 1, %v3882_v46  ;;  %v1009_v63 = vld [vmem:[%s4833_s1 + $0x60] sm:$0xff] (!%p114_p2)  ;;  %vm2946_vm3 = vcmask (!%p114_p2), 31744   ;;  %vm2979_vm4 = vcmask (!%p114_p2), 48128  }
   0xa   : > { %3610 = vmatprep.subr.bf16.mxu0 (!%p114_p2), %v3609_v12  ;;  %v3621_v2 = vpack.c.bf16 (!%p114_p2), %v1009_v63, %v1008_v62 }
   0xb   : > { %v3892_v53 = vrot.slane (!%p114_p2), %v179_v50, %v343_v48  ;;  %v3896_v54 = vrot.slane (!%p114_p2), %v179_v50, %v507_v49 }
   0xc   : > { %3622 = vmatprep.subr.bf16.mxu1 (!%p114_p2), %v3621_v2 }
   0xd   : > { %s4836_s11 = smov (!%p136_p3, %s3073_s11), 63  ;;  %3612 = vmatpush3.bf16.msra.mxu0 %v3609_v12  ;;  %3624 = vmatpush3.bf16.msra.mxu1 %v3621_v2 }
   0xe   : > { %s3074_s16 = sshll.u32 %s4836_s11, 3  ;;  %3614 = vmatprep.subr.bf16.mxu0 %v3613_v14 }
   0xf   : > { %s3828_s19 = scalar_lea.vmem %s4832_s0, %s3074_s16  ;;  %s4668_s6 = scalar_lea.vmem %s4834_s2, %s3074_s16 }
  0x10   : > { %v148_v4 = vld [vmem:[%s3828_s19 + $0x8] sm:$0xff]  ;;  %v147_v5 = vld [vmem:[%s3828_s19] sm:$0xff]  ;;  %v149_v7 = vld [vmem:[%s3828_s19 + $0x10] sm:$0xff] }
  0x11   : > { %188 = vperm.xlu1 %3675, %v148_v4   ;;  %183 = vperm.xlu0 %3673, %v147_v5   ;;  %v150_v9 = vld [vmem:[%s3828_s19 + $0x18] sm:$0xff]  ;;  %v151_v17 = vld [vmem:[%s3828_s19 + $0x20] sm:$0xff]  ;;  %v152_v19 = vld [vmem:[%s3828_s19 + $0x28] sm:$0xff] }
  0x12   : > { %3616 = vmatpush3.bf16.msra.mxu0 %v3613_v14  ;;  %v153_v20 = vld [vmem:[%s3828_s19 + $0x30] sm:$0xff]  ;;  %v154_v21 = vld [vmem:[%s3828_s19 + $0x38] sm:$0xff]  ;;  %v155_v22 = vld [vmem:[%s3828_s19 + $0x40] sm:$0xff] }
  0x13   : > { %3618 = vmatprep.subr.bf16.mxu0 %v3617_v18  ;;  %v156_v23 = vld [vmem:[%s3828_s19 + $0x48] sm:$0xff]  ;;  %v157_v24 = vld [vmem:[%s3828_s19 + $0x50] sm:$0xff]  ;;  %v158_v25 = vld [vmem:[%s3828_s19 + $0x58] sm:$0xff] }
  0x14   : > { %v159_v26 = vld [vmem:[%s3828_s19 + $0x60] sm:$0xff]  ;;  %v160_v27 = vld [vmem:[%s3828_s19 + $0x68] sm:$0xff]  ;;  %v161_v28 = vld [vmem:[%s3828_s19 + $0x70] sm:$0xff] }
  0x15   : > { %3676 = vset.pattern.permute.xlu1 %v3786_v6  ;;  %3674 = vset.pattern.permute.xlu0 %v3786_v6  ;;  %v162_v29 = vld [vmem:[%s3828_s19 + $0x78] sm:$0xff]  ;;  %v163_v30 = vld [vmem:[%s3828_s19 + $0x80] sm:$0xff]  ;;  %v164_v31 = vld [vmem:[%s3828_s19 + $0x88] sm:$0xff] }
  0x16   : > { %382 = vperm.xlu1 %3676, %v148_v4   ;;  %378 = vperm.xlu0 %3674, %v147_v5   ;;  %v165_v32 = vld [vmem:[%s3828_s19 + $0x90] sm:$0xff]  ;;  %v166_v33 = vld [vmem:[%s3828_s19 + $0x98] sm:$0xff]  ;;  %v167_v34 = vld [vmem:[%s3828_s19 + $0xa0] sm:$0xff] }
  0x17   : > { %3620 = vmatpush3.bf16.msra.mxu0 %v3617_v18  ;;  %v168_v35 = vld [vmem:[%s3828_s19 + $0xa8] sm:$0xff]  ;;  %v169_v36 = vld [vmem:[%s3828_s19 + $0xb0] sm:$0xff]  ;;  %v170_v37 = vld [vmem:[%s3828_s19 + $0xb8] sm:$0xff] }
  0x18   : > { %v171_v38 = vld [vmem:[%s3828_s19 + $0xc0] sm:$0xff]  ;;  %v172_v39 = vld [vmem:[%s3828_s19 + $0xc8] sm:$0xff]  ;;  %v173_v40 = vld [vmem:[%s3828_s19 + $0xd0] sm:$0xff] }
  0x19   : > { %v174_v41 = vld [vmem:[%s3828_s19 + $0xd8] sm:$0xff]  ;;  %v175_v42 = vld [vmem:[%s3828_s19 + $0xe0] sm:$0xff]  ;;  %v176_v43 = vld [vmem:[%s3828_s19 + $0xe8] sm:$0xff] }
  0x1a   : > { %3677 = vset.pattern.permute.xlu1 %v3785_v0  ;;  %386 = vperm.xlu0 %3674, %v149_v7   ;;  %v177_v45 = vld [vmem:[%s3828_s19 + $0xf0] sm:$0xff]  ;;  %v178_v47 = vld [vmem:[%s3828_s19 + $0xf8] sm:$0xff] }
  0x1b   : > { %193 = vperm.xlu1 %3677, %v149_v7  }
  0x1e   : > { %390 = vperm.xlu0 %3674, %v150_v9  }
  0x1f   : > { %198 = vperm.xlu1 %3677, %v150_v9  }
  0x22   : > { %394 = vperm.xlu0 %3674, %v151_v17  }
  0x23   : > { %203 = vperm.xlu1 %3677, %v151_v17  }
  0x26   : > { %398 = vperm.xlu0 %3674, %v152_v19  }
  0x27   : > { %208 = vperm.xlu1 %3677, %v152_v19  }
  0x2a   : > { %402 = vperm.xlu0 %3674, %v153_v20  }
  0x2b   : > { %213 = vperm.xlu1 %3677, %v153_v20  }
  0x2e   : > { %406 = vperm.xlu0 %3674, %v154_v21  }
  0x2f   : > { %218 = vperm.xlu1 %3677, %v154_v21  }
  0x32   : > { %410 = vperm.xlu0 %3674, %v155_v22  }
  0x33   : > { %223 = vperm.xlu1 %3677, %v155_v22  }
  0x36   : > { %414 = vperm.xlu0 %3674, %v156_v23  }
  0x37   : > { %228 = vperm.xlu1 %3677, %v156_v23  }
  0x3a   : > { %418 = vperm.xlu0 %3674, %v157_v24  }
  0x3b   : > { %233 = vperm.xlu1 %3677, %v157_v24  }
  0x3e   : > { %422 = vperm.xlu0 %3674, %v158_v25  }
  0x3f   : > { %238 = vperm.xlu1 %3677, %v158_v25  }
  0x42   : > { %426 = vperm.xlu0 %3674, %v159_v26  }
  0x43   : > { %243 = vperm.xlu1 %3677, %v159_v26  }
  0x46   : > { %430 = vperm.xlu0 %3674, %v160_v27  }
  0x47   : > { %248 = vperm.xlu1 %3677, %v160_v27  }
  0x4a   : > { %434 = vperm.xlu0 %3674, %v161_v28  }
  0x4b   : > { %253 = vperm.xlu1 %3677, %v161_v28  }
  0x4e   : > { %438 = vperm.xlu0 %3674, %v162_v29  }
  0x4f   : > { %258 = vperm.xlu1 %3677, %v162_v29  }
  0x52   : > { %442 = vperm.xlu0 %3674, %v163_v30  }
  0x53   : > { %263 = vperm.xlu1 %3677, %v163_v30  }
  0x56   : > { %446 = vperm.xlu0 %3674, %v164_v31  }
  0x57   : > { %268 = vperm.xlu1 %3677, %v164_v31  }
  0x5a   : > { %450 = vperm.xlu0 %3674, %v165_v32  }
  0x5b   : > { %273 = vperm.xlu1 %3677, %v165_v32  }
  0x5e   : > { %454 = vperm.xlu0 %3674, %v166_v33  }
  0x5f   : > { %278 = vperm.xlu1 %3677, %v166_v33  }
  0x62   : > { %458 = vperm.xlu0 %3674, %v167_v34  }
  0x63   : > { %283 = vperm.xlu1 %3677, %v167_v34  }
  0x66   : > { %462 = vperm.xlu0 %3674, %v168_v35  }
  0x67   : > { %288 = vperm.xlu1 %3677, %v168_v35  }
  0x6a   : > { %466 = vperm.xlu0 %3674, %v169_v36  }
  0x6b   : > { %293 = vperm.xlu1 %3677, %v169_v36  }
  0x6e   : > { %470 = vperm.xlu0 %3674, %v170_v37  }
  0x6f   : > { %298 = vperm.xlu1 %3677, %v170_v37  }
  0x72   : > { %474 = vperm.xlu0 %3674, %v171_v38  }
  0x73   : > { %303 = vperm.xlu1 %3677, %v171_v38  }
  0x76   : > { %478 = vperm.xlu0 %3674, %v172_v39  }
  0x77   : > { %308 = vperm.xlu1 %3677, %v172_v39  }
  0x7a   : > { %482 = vperm.xlu0 %3674, %v173_v40  }
  0x7b   : > { %313 = vperm.xlu1 %3677, %v173_v40  }
  0x7e   : > { %486 = vperm.xlu0 %3674, %v174_v41  }
  0x7f   : > { %318 = vperm.xlu1 %3677, %v174_v41  }
  0x82   : > { %490 = vperm.xlu0 %3674, %v175_v42  }
  0x83   : > { %323 = vperm.xlu1 %3677, %v175_v42  }
  0x86   : > { %494 = vperm.xlu0 %3674, %v176_v43  }
  0x87   : > { %328 = vperm.xlu1 %3677, %v176_v43  }
  0x8a   : > { %498 = vperm.xlu0 %3674, %v177_v45  }
  0x8b   : > { %333 = vperm.xlu1 %3677, %v177_v45  }
  0x8e   : > { %502 = vperm.xlu0 %3674, %v178_v47  }
  0x8f   : > { %338 = vperm.xlu1 %3677, %v178_v47  }
  0x90   : > { %v189_v51 = vpop.permute.xlu1 %188  ;;  %v184_v52 = vpop.permute.xlu0 %183 }
  0x91   : > { %v346_v57 = vmul.f32 %v3892_v53, %v189_v51  ;;  %v345_v58 = vmul.f32 %v3892_v53, %v184_v52 }
  0x92   : > { %3678 = vset.pattern.permute.xlu0 %v3785_v0 }
  0x93   : > { %3679 = vset.pattern.permute.xlu1 %v3786_v6 }
  0x95   : > { %v383_v55 = vpop.permute.xlu1 %382  ;;  %v379_v56 = vpop.permute.xlu0 %378 }
  0x96   : > { %v510_v59 = vmul.f32 %v3896_v54, %v383_v55  ;;  %v509_v60 = vmul.f32 %v3896_v54, %v379_v56 }
  0x98   : > { %v542_v0 = vadd.f32 %v510_v59, %v346_v57  ;;  %v541_v1 = vadd.f32 %v509_v60, %v345_v58 }
  0x99   : > { %v387_v3 = vpop.permute.xlu0 %386 }
  0x9a   : > { %v578_v4 = vadd.f32 %v3907_v61, %v542_v0  ;;  %v511_v5 = vmul.f32 %v3896_v54, %v387_v3  ;;  %v194_v7 = vpop.permute.xlu1 %193  ;;  %v577_v8 = vadd.f32 %v3907_v61, %v541_v1 }
  0x9b   : > { %v347_v9 = vmul.f32 %v3892_v53, %v194_v7 }
  0x9c   : > { %v610_v10 = vmax.f32 %v578_v4, 0.0  ;;  %v609_v11 = vmax.f32 %v577_v8, 0.0 }
  0x9d   : > { %v543_v12 = vadd.f32 %v511_v5, %v347_v9  ;;  %v391_v13 = vpop.permute.xlu0 %390 }
  0x9e   : > { %v512_v14 = vmul.f32 %v3896_v54, %v391_v13  ;;  %v199_v15 = vpop.permute.xlu1 %198  ;;  %3381 = vmatprep.mubr.msk.f32.mxu0 %vm654_vm0, %v609_v11 }
  0x9f   : > { %v579_v16 = vadd.f32 %v3907_v61, %v543_v12  ;;  %v348_v17 = vmul.f32 %v3892_v53, %v199_v15  ;;  %3382 = vmatmul.mubr.msk.f32.vlgmr.msra.gmra.mrb[0].mxu0 %vm654_vm0, %v610_v10 }
  0xa1   : > { %v611_v18 = vmax.f32 %v579_v16, 0.0  ;;  %v544_v19 = vadd.f32 %v512_v14, %v348_v17  ;;  %v395_v20 = vpop.permute.xlu0 %394 }
  0xa2   : > { %v513_v21 = vmul.f32 %v3896_v54, %v395_v20  ;;  %v204_v22 = vpop.permute.xlu1 %203 }
  0xa3   : > { %v580_v23 = vadd.f32 %v3907_v61, %v544_v19  ;;  %v349_v24 = vmul.f32 %v3892_v53, %v204_v22  ;;  %3384 = vmatprep.mubr.msk.f32.mxu0 %vm654_vm0, %v611_v18 }
  0xa5   : > { %v612_v25 = vmax.f32 %v580_v23, 0.0  ;;  %v545_v26 = vadd.f32 %v513_v21, %v349_v24  ;;  %v399_v27 = vpop.permute.xlu0 %398 }
  0xa6   : > { %v514_v28 = vmul.f32 %v3896_v54, %v399_v27  ;;  %v209_v29 = vpop.permute.xlu1 %208 }
  0xa7   : > { %v581_v30 = vadd.f32 %v3907_v61, %v545_v26  ;;  %v350_v31 = vmul.f32 %v3892_v53, %v209_v29  ;;  %3385 = vmatmul.mubr.msk.f32.gmra.mrb[2].mxu0 %vm654_vm0, %v612_v25 }
  0xa9   : > { %v613_v32 = vmax.f32 %v581_v30, 0.0  ;;  %v546_v33 = vadd.f32 %v514_v28, %v350_v31  ;;  %v403_v34 = vpop.permute.xlu0 %402 }
  0xaa   : > { %v515_v35 = vmul.f32 %v3896_v54, %v403_v34  ;;  %v214_v36 = vpop.permute.xlu1 %213 }
  0xab   : > { %v582_v37 = vadd.f32 %v3907_v61, %v546_v33  ;;  %v351_v38 = vmul.f32 %v3892_v53, %v214_v36  ;;  %3387 = vmatprep.mubr.msk.f32.mxu0 %vm654_vm0, %v613_v32 }
  0xad   : > { %v614_v39 = vmax.f32 %v582_v37, 0.0  ;;  %v547_v40 = vadd.f32 %v515_v35, %v351_v38  ;;  %v407_v41 = vpop.permute.xlu0 %406 }
  0xae   : > { %v516_v42 = vmul.f32 %v3896_v54, %v407_v41  ;;  %v219_v43 = vpop.permute.xlu1 %218 }
  0xaf   : > { %v583_v44 = vadd.f32 %v3907_v61, %v547_v40  ;;  %v352_v45 = vmul.f32 %v3892_v53, %v219_v43  ;;  %3388 = vmatmul.mubr.msk.f32.gmra.mrb[4].mxu0 %vm654_vm0, %v614_v39 }
  0xb1   : > { %v615_v47 = vmax.f32 %v583_v44, 0.0  ;;  %v548_v50 = vadd.f32 %v516_v42, %v352_v45  ;;  %v411_v51 = vpop.permute.xlu0 %410 }
  0xb2   : > { %v517_v52 = vmul.f32 %v3896_v54, %v411_v51  ;;  %v224_v55 = vpop.permute.xlu1 %223 }
  0xb3   : > { %v584_v56 = vadd.f32 %v3907_v61, %v548_v50  ;;  %v353_v57 = vmul.f32 %v3892_v53, %v224_v55  ;;  %3390 = vmatprep.mubr.msk.f32.mxu0 %vm654_vm0, %v615_v47 }
  0xb5   : > { %v616_v58 = vmax.f32 %v584_v56, 0.0  ;;  %v549_v59 = vadd.f32 %v517_v52, %v353_v57  ;;  %v415_v60 = vpop.permute.xlu0 %414 }
  0xb6   : > { %v518_v62 = vmul.f32 %v3896_v54, %v415_v60  ;;  %v229_v63 = vpop.permute.xlu1 %228 }
  0xb7   : > { %v585_v0 = vadd.f32 %v3907_v61, %v549_v59  ;;  %v354_v1 = vmul.f32 %v3892_v53, %v229_v63  ;;  %3391 = vmatmul.mubr.msk.f32.gmra.mrb[6].mxu0 %vm654_vm0, %v616_v58 }
  0xb9   : > { %v617_v2 = vmax.f32 %v585_v0, 0.0  ;;  %v550_v3 = vadd.f32 %v518_v62, %v354_v1  ;;  %v419_v4 = vpop.permute.xlu0 %418 }
  0xba   : > { %v519_v5 = vmul.f32 %v3896_v54, %v419_v4  ;;  %v234_v7 = vpop.permute.xlu1 %233 }
  0xbb   : > { %v586_v8 = vadd.f32 %v3907_v61, %v550_v3  ;;  %v355_v9 = vmul.f32 %v3892_v53, %v234_v7  ;;  %3393 = vmatprep.mubr.msk.f32.mxu0 %vm654_vm0, %v617_v2 }
  0xbd   : > { %v618_v10 = vmax.f32 %v586_v8, 0.0  ;;  %v551_v11 = vadd.f32 %v519_v5, %v355_v9  ;;  %v423_v12 = vpop.permute.xlu0 %422 }
  0xbe   : > { %v520_v13 = vmul.f32 %v3896_v54, %v423_v12  ;;  %v239_v14 = vpop.permute.xlu1 %238 }
  0xbf   : > { %v587_v15 = vadd.f32 %v3907_v61, %v551_v11  ;;  %v356_v16 = vmul.f32 %v3892_v53, %v239_v14  ;;  %3394 = vmatmul.mubr.msk.f32.gmra.mrb[8].mxu0 %vm654_vm0, %v618_v10 }
  0xc1   : > { %v619_v17 = vmax.f32 %v587_v15, 0.0  ;;  %v552_v18 = vadd.f32 %v520_v13, %v356_v16  ;;  %v427_v19 = vpop.permute.xlu0 %426 }
  0xc2   : > { %v521_v20 = vmul.f32 %v3896_v54, %v427_v19  ;;  %v244_v21 = vpop.permute.xlu1 %243 }
  0xc3   : > { %v588_v22 = vadd.f32 %v3907_v61, %v552_v18  ;;  %v357_v23 = vmul.f32 %v3892_v53, %v244_v21  ;;  %3396 = vmatprep.mubr.msk.f32.mxu0 %vm654_vm0, %v619_v17 }
  0xc5   : > { %v620_v24 = vmax.f32 %v588_v22, 0.0  ;;  %v553_v25 = vadd.f32 %v521_v20, %v357_v23  ;;  %v431_v26 = vpop.permute.xlu0 %430 }
  0xc6   : > { %v522_v27 = vmul.f32 %v3896_v54, %v431_v26  ;;  %v249_v28 = vpop.permute.xlu1 %248 }
  0xc7   : > { %v589_v29 = vadd.f32 %v3907_v61, %v553_v25  ;;  %v358_v30 = vmul.f32 %v3892_v53, %v249_v28  ;;  %3397 = vmatmul.mubr.msk.f32.gmra.mrb[10].mxu0 %vm654_vm0, %v620_v24 }
  0xc9   : > { %v621_v31 = vmax.f32 %v589_v29, 0.0  ;;  %v554_v32 = vadd.f32 %v522_v27, %v358_v30  ;;  %v435_v33 = vpop.permute.xlu0 %434 }
  0xca   : > { %v523_v34 = vmul.f32 %v3896_v54, %v435_v33  ;;  %v254_v35 = vpop.permute.xlu1 %253 }
  0xcb   : > { %v590_v36 = vadd.f32 %v3907_v61, %v554_v32  ;;  %v359_v37 = vmul.f32 %v3892_v53, %v254_v35  ;;  %3399 = vmatprep.mubr.msk.f32.mxu0 %vm654_vm0, %v621_v31 }
  0xcd   : > { %v622_v38 = vmax.f32 %v590_v36, 0.0  ;;  %v555_v39 = vadd.f32 %v523_v34, %v359_v37  ;;  %v439_v40 = vpop.permute.xlu0 %438 }
  0xce   : > { %v524_v41 = vmul.f32 %v3896_v54, %v439_v40  ;;  %v259_v42 = vpop.permute.xlu1 %258 }
  0xcf   : > { %v591_v43 = vadd.f32 %v3907_v61, %v555_v39  ;;  %v360_v44 = vmul.f32 %v3892_v53, %v259_v42  ;;  %3400 = vmatmul.mubr.msk.f32.gmra.mrb[12].mxu0 %vm654_vm0, %v622_v38 }
  0xd1   : > { %v623_v45 = vmax.f32 %v591_v43, 0.0  ;;  %v556_v47 = vadd.f32 %v524_v41, %v360_v44  ;;  %v443_v50 = vpop.permute.xlu0 %442 }
  0xd2   : > { %v525_v51 = vmul.f32 %v3896_v54, %v443_v50  ;;  %v264_v52 = vpop.permute.xlu1 %263 }
  0xd3   : > { %v592_v55 = vadd.f32 %v3907_v61, %v556_v47  ;;  %v361_v56 = vmul.f32 %v3892_v53, %v264_v52  ;;  %3402 = vmatprep.mubr.msk.f32.mxu0 %vm654_vm0, %v623_v45  ;;  %v1010_v52 = vld [vmem:[%s4833_s1 + $0x68] sm:$0xff] }
  0xd5   : > { %v624_v57 = vmax.f32 %v592_v55, 0.0  ;;  %v557_v58 = vadd.f32 %v525_v51, %v361_v56  ;;  %v447_v59 = vpop.permute.xlu0 %446  ;;  %v1011_v55 = vld [vmem:[%s4833_s1 + $0x70] sm:$0xff] }
  0xd6   : > { %v526_v60 = vmul.f32 %v3896_v54, %v447_v59  ;;  %v269_v62 = vpop.permute.xlu1 %268 }
  0xd7   : > { %v593_v63 = vadd.f32 %v3907_v61, %v557_v58  ;;  %v362_v0 = vmul.f32 %v3892_v53, %v269_v62  ;;  %3403 = vmatmul.mubr.msk.f32.gmra.mrb[14].mxu0 %vm654_vm0, %v624_v57  ;;  %v3625_v58 = vpack.c.bf16 %v1011_v55, %v1010_v52 }
  0xd9   : > { %v625_v1 = vmax.f32 %v593_v63, 0.0  ;;  %v558_v2 = vadd.f32 %v526_v60, %v362_v0  ;;  %v451_v3 = vpop.permute.xlu0 %450  ;;  %3626 = vmatprep.subr.bf16.mxu1 %v3625_v58 }
  0xda   : > { %v527_v4 = vmul.f32 %v3896_v54, %v451_v3  ;;  %v274_v5 = vpop.permute.xlu1 %273  ;;  %3628 = vmatpush3.bf16.msra.mxu1 %v3625_v58 }
  0xdb   : > { %v594_v7 = vadd.f32 %v3907_v61, %v558_v2  ;;  %v363_v8 = vmul.f32 %v3892_v53, %v274_v5  ;;  %3405 = vmatprep.mubr.msk.f32.mxu0 %vm654_vm0, %v625_v1 }
  0xdd   : > { %v626_v9 = vmax.f32 %v594_v7, 0.0  ;;  %v559_v10 = vadd.f32 %v527_v4, %v363_v8  ;;  %v455_v11 = vpop.permute.xlu0 %454 }
  0xde   : > { %v528_v12 = vmul.f32 %v3896_v54, %v455_v11  ;;  %v279_v13 = vpop.permute.xlu1 %278 }
  0xdf   : > { %v595_v14 = vadd.f32 %v3907_v61, %v559_v10  ;;  %v364_v15 = vmul.f32 %v3892_v53, %v279_v13  ;;  %3406 = vmatmul.mubr.msk.f32.gmra.mrb[16].mxu0 %vm654_vm0, %v626_v9 }
  0xe1   : > { %v627_v16 = vmax.f32 %v595_v14, 0.0  ;;  %v560_v17 = vadd.f32 %v528_v12, %v364_v15  ;;  %v459_v18 = vpop.permute.xlu0 %458 }
  0xe2   : > { %v529_v19 = vmul.f32 %v3896_v54, %v459_v18  ;;  %v284_v20 = vpop.permute.xlu1 %283 }
  0xe3   : > { %v596_v21 = vadd.f32 %v3907_v61, %v560_v17  ;;  %v365_v22 = vmul.f32 %v3892_v53, %v284_v20  ;;  %3408 = vmatprep.mubr.msk.f32.mxu0 %vm654_vm0, %v627_v16 }
  0xe5   : > { %v628_v23 = vmax.f32 %v596_v21, 0.0  ;;  %v561_v24 = vadd.f32 %v529_v19, %v365_v22  ;;  %v463_v25 = vpop.permute.xlu0 %462 }
  0xe6   : > { %v530_v26 = vmul.f32 %v3896_v54, %v463_v25  ;;  %v289_v27 = vpop.permute.xlu1 %288 }
  0xe7   : > { %v597_v28 = vadd.f32 %v3907_v61, %v561_v24  ;;  %v366_v29 = vmul.f32 %v3892_v53, %v289_v27  ;;  %3409 = vmatmul.mubr.msk.f32.gmra.mrb[18].mxu0 %vm654_vm0, %v628_v23 }
  0xe9   : > { %v629_v30 = vmax.f32 %v597_v28, 0.0  ;;  %v562_v31 = vadd.f32 %v530_v26, %v366_v29  ;;  %v467_v32 = vpop.permute.xlu0 %466 }
  0xea   : > { %v531_v33 = vmul.f32 %v3896_v54, %v467_v32  ;;  %v294_v34 = vpop.permute.xlu1 %293 }
  0xeb   : > { %v598_v35 = vadd.f32 %v3907_v61, %v562_v31  ;;  %v367_v36 = vmul.f32 %v3892_v53, %v294_v34  ;;  %3411 = vmatprep.mubr.msk.f32.mxu0 %vm654_vm0, %v629_v30 }
  0xed   : > { %v630_v37 = vmax.f32 %v598_v35, 0.0  ;;  %v563_v38 = vadd.f32 %v531_v33, %v367_v36  ;;  %v471_v39 = vpop.permute.xlu0 %470 }
  0xee   : > { %v532_v40 = vmul.f32 %v3896_v54, %v471_v39  ;;  %v299_v41 = vpop.permute.xlu1 %298 }
  0xef   : > { %v599_v42 = vadd.f32 %v3907_v61, %v563_v38  ;;  %v368_v43 = vmul.f32 %v3892_v53, %v299_v41  ;;  %3412 = vmatmul.mubr.msk.f32.gmra.mrb[20].mxu0 %vm654_vm0, %v630_v37 }
  0xf1   : > { %v631_v44 = vmax.f32 %v599_v42, 0.0  ;;  %v564_v45 = vadd.f32 %v532_v40, %v368_v43  ;;  %v475_v47 = vpop.permute.xlu0 %474 }
  0xf2   : > { %v533_v50 = vmul.f32 %v3896_v54, %v475_v47  ;;  %v304_v51 = vpop.permute.xlu1 %303 }
  0xf3   : > { %v600_v56 = vadd.f32 %v3907_v61, %v564_v45  ;;  %v369_v57 = vmul.f32 %v3892_v53, %v304_v51  ;;  %3414 = vmatprep.mubr.msk.f32.mxu0 %vm654_vm0, %v631_v44 }
  0xf5   : > { %v632_v59 = vmax.f32 %v600_v56, 0.0  ;;  %v565_v60 = vadd.f32 %v533_v50, %v369_v57  ;;  %v479_v62 = vpop.permute.xlu0 %478 }
  0xf6   : > { %v534_v63 = vmul.f32 %v3896_v54, %v479_v62  ;;  %v309_v0 = vpop.permute.xlu1 %308 }
  0xf7   : > { %v601_v1 = vadd.f32 %v3907_v61, %v565_v60  ;;  %v370_v2 = vmul.f32 %v3892_v53, %v309_v0  ;;  %3415 = vmatmul.mubr.msk.f32.gmra.mrb[22].mxu0 %vm654_vm0, %v632_v59 }
  0xf9   : > { %v633_v3 = vmax.f32 %v601_v1, 0.0  ;;  %v566_v4 = vadd.f32 %v534_v63, %v370_v2  ;;  %v483_v5 = vpop.permute.xlu0 %482 }
  0xfa   : > { %v535_v7 = vmul.f32 %v3896_v54, %v483_v5  ;;  %v314_v8 = vpop.permute.xlu1 %313 }
  0xfb   : > { %v602_v9 = vadd.f32 %v3907_v61, %v566_v4  ;;  %v371_v10 = vmul.f32 %v3892_v53, %v314_v8  ;;  %3417 = vmatprep.mubr.msk.f32.mxu0 %vm654_vm0, %v633_v3 }
  0xfd   : > { %v634_v11 = vmax.f32 %v602_v9, 0.0  ;;  %v567_v12 = vadd.f32 %v535_v7, %v371_v10  ;;  %v487_v13 = vpop.permute.xlu0 %486 }
  0xfe   : > { %v536_v14 = vmul.f32 %v3896_v54, %v487_v13  ;;  %v319_v15 = vpop.permute.xlu1 %318 }
  0xff   : > { %v603_v16 = vadd.f32 %v3907_v61, %v567_v12  ;;  %v372_v17 = vmul.f32 %v3892_v53, %v319_v15  ;;  %3418 = vmatmul.mubr.msk.f32.gmra.mrb[24].mxu0 %vm654_vm0, %v634_v11 }
 0x101   : > { %v635_v18 = vmax.f32 %v603_v16, 0.0  ;;  %v568_v19 = vadd.f32 %v536_v14, %v372_v17  ;;  %v491_v20 = vpop.permute.xlu0 %490 }
 0x102   : > { %v537_v21 = vmul.f32 %v3896_v54, %v491_v20  ;;  %v324_v22 = vpop.permute.xlu1 %323 }
 0x103   : > { %v604_v23 = vadd.f32 %v3907_v61, %v568_v19  ;;  %v373_v24 = vmul.f32 %v3892_v53, %v324_v22  ;;  %3420 = vmatprep.mubr.msk.f32.mxu0 %vm654_vm0, %v635_v18 }
 0x105   : > { %v636_v25 = vmax.f32 %v604_v23, 0.0  ;;  %v569_v26 = vadd.f32 %v537_v21, %v373_v24  ;;  %v495_v27 = vpop.permute.xlu0 %494 }
 0x106   : > { %v538_v28 = vmul.f32 %v3896_v54, %v495_v27  ;;  %v329_v29 = vpop.permute.xlu1 %328 }
 0x107   : > { %v605_v30 = vadd.f32 %v3907_v61, %v569_v26  ;;  %v374_v31 = vmul.f32 %v3892_v53, %v329_v29  ;;  %3421 = vmatmul.mubr.msk.f32.gmra.mrb[26].mxu0 %vm654_vm0, %v636_v25 }
 0x109   : > { %v637_v32 = vmax.f32 %v605_v30, 0.0  ;;  %v570_v33 = vadd.f32 %v538_v28, %v374_v31  ;;  %v499_v34 = vpop.permute.xlu0 %498 }
 0x10a   : > { %v539_v35 = vmul.f32 %v3896_v54, %v499_v34  ;;  %v334_v36 = vpop.permute.xlu1 %333 }
 0x10b   : > { %v606_v37 = vadd.f32 %v3907_v61, %v570_v33  ;;  %v375_v38 = vmul.f32 %v3892_v53, %v334_v36  ;;  %3423 = vmatprep.mubr.msk.f32.mxu0 %vm654_vm0, %v637_v32 }
 0x10d   : > { %v638_v39 = vmax.f32 %v606_v37, 0.0  ;;  %v571_v40 = vadd.f32 %v539_v35, %v375_v38  ;;  %v503_v41 = vpop.permute.xlu0 %502 }
 0x10e   : > { %v540_v42 = vmul.f32 %v3896_v54, %v503_v41  ;;  %v339_v43 = vpop.permute.xlu1 %338  ;;  %v4048_v54 = vld [vmem:[%s4833_s1 + $0x50] ss:$0 sm:$0xff] }
 0x10f   : > { %v607_v44 = vadd.f32 %v3907_v61, %v571_v40  ;;  %v376_v45 = vmul.f32 %v3892_v53, %v339_v43  ;;  %3424 = vmatmul.mubr.msk.f32.gmra.mrb[28].mxu0 %vm654_vm0, %v638_v39 }
 0x111   : > { %v639_v47 = vmax.f32 %v607_v44, 0.0  ;;  %v572_v50 = vadd.f32 %v540_v42, %v376_v45 }
 0x113   : > { %v608_v51 = vadd.f32 %v3907_v61, %v572_v50  ;;  %3426 = vmatprep.mubr.msk.f32.mxu0 %vm654_vm0, %v639_v47 }
 0x115   : > { %v640_v52 = vmax.f32 %v608_v51, 0.0 }
 0x117   : > { %3427 = vmatmul.mubr.msk.f32.gmra.mrb[30].mxu0 %vm654_vm0, %v640_v52 }
 0x172   : > { %v3383_v55 = vpop.f32.mrb[0].mxu0 }
 0x173   : > { %v823_v56 = vadd.f32 %v3383_v55, %v4048_v54  ;;  %v817_v53 = vpop.f32.mrb[1].mxu0 }
 0x174   : > { %v818_v57 = vadd.f32 %v4048_v54, %v817_v53 }
 0x175   : > { %v977_v59 = vmax.f32 %v823_v56, 0.0 }
 0x176   : > { %v976_v58 = vmax.f32 %v818_v57, 0.0 }
 0x178   : > { %3437 = vmatprep.mubr.msk.f32.mxu1 %vm1017_vm1, %v976_v58 }
 0x179   : > { %3438 = vmatmul.mubr.msk.f32.vlgmr.msra.gmra.mrb[0].mxu1 %vm1017_vm1, %v977_v59 }
 0x17a   : > { %v3386_v61 = vpop.f32.mrb[2].mxu0 }
 0x17b   : > { %v833_v60 = vadd.f32 %v3386_v61, %v4048_v54  ;;  %v827_v62 = vpop.f32.mrb[3].mxu0 }
 0x17c   : > { %v828_v63 = vadd.f32 %v4048_v54, %v827_v62 }
 0x17d   : > { %v979_v1 = vmax.f32 %v833_v60, 0.0 }
 0x17e   : > { %v978_v0 = vmax.f32 %v828_v63, 0.0 }
 0x180   : > { %3440 = vmatprep.mubr.msk.f32.mxu1 %vm1017_vm1, %v978_v0 }
 0x181   : > { %3441 = vmatmul.mubr.msk.f32.gmra.mrb[2].mxu1 %vm1017_vm1, %v979_v1 }
 0x182   : > { %v3389_v2 = vpop.f32.mrb[4].mxu0 }
 0x183   : > { %v843_v3 = vadd.f32 %v3389_v2, %v4048_v54  ;;  %v837_v4 = vpop.f32.mrb[5].mxu0 }
 0x184   : > { %v838_v5 = vadd.f32 %v4048_v54, %v837_v4 }
 0x185   : > { %v981_v8 = vmax.f32 %v843_v3, 0.0 }
 0x186   : > { %v980_v7 = vmax.f32 %v838_v5, 0.0 }
 0x188   : > { %3443 = vmatprep.mubr.msk.f32.mxu1 %vm1017_vm1, %v980_v7 }
 0x189   : > { %3444 = vmatmul.mubr.msk.f32.gmra.mrb[4].mxu1 %vm1017_vm1, %v981_v8 }
 0x18a   : > { %v3392_v9 = vpop.f32.mrb[6].mxu0 }
 0x18b   : > { %v853_v10 = vadd.f32 %v3392_v9, %v4048_v54  ;;  %v847_v11 = vpop.f32.mrb[7].mxu0 }
 0x18c   : > { %v848_v12 = vadd.f32 %v4048_v54, %v847_v11 }
 0x18d   : > { %v983_v14 = vmax.f32 %v853_v10, 0.0 }
 0x18e   : > { %v982_v13 = vmax.f32 %v848_v12, 0.0 }
 0x190   : > { %3446 = vmatprep.mubr.msk.f32.mxu1 %vm1017_vm1, %v982_v13 }
 0x191   : > { %3447 = vmatmul.mubr.msk.f32.gmra.mrb[6].mxu1 %vm1017_vm1, %v983_v14 }
 0x192   : > { %v3395_v15 = vpop.f32.mrb[8].mxu0 }
 0x193   : > { %v863_v16 = vadd.f32 %v3395_v15, %v4048_v54  ;;  %v857_v17 = vpop.f32.mrb[9].mxu0 }
 0x194   : > { %v858_v18 = vadd.f32 %v4048_v54, %v857_v17 }
 0x195   : > { %v985_v20 = vmax.f32 %v863_v16, 0.0 }
 0x196   : > { %v984_v19 = vmax.f32 %v858_v18, 0.0 }
 0x198   : > { %3449 = vmatprep.mubr.msk.f32.mxu1 %vm1017_vm1, %v984_v19 }
 0x199   : > { %3450 = vmatmul.mubr.msk.f32.gmra.mrb[8].mxu1 %vm1017_vm1, %v985_v20 }
 0x19a   : > { %v3398_v21 = vpop.f32.mrb[10].mxu0 }
 0x19b   : > { %v873_v22 = vadd.f32 %v3398_v21, %v4048_v54  ;;  %v867_v23 = vpop.f32.mrb[11].mxu0 }
 0x19c   : > { %v868_v24 = vadd.f32 %v4048_v54, %v867_v23 }
 0x19d   : > { %v987_v26 = vmax.f32 %v873_v22, 0.0 }
 0x19e   : > { %v986_v25 = vmax.f32 %v868_v24, 0.0 }
 0x1a0   : > { %3452 = vmatprep.mubr.msk.f32.mxu1 %vm1017_vm1, %v986_v25 }
 0x1a1   : > { %3453 = vmatmul.mubr.msk.f32.gmra.mrb[10].mxu1 %vm1017_vm1, %v987_v26 }
 0x1a2   : > { %v3401_v27 = vpop.f32.mrb[12].mxu0 }
 0x1a3   : > { %v883_v28 = vadd.f32 %v3401_v27, %v4048_v54  ;;  %v877_v29 = vpop.f32.mrb[13].mxu0 }
 0x1a4   : > { %v878_v30 = vadd.f32 %v4048_v54, %v877_v29 }
 0x1a5   : > { %v989_v32 = vmax.f32 %v883_v28, 0.0  ;;  %v4117_v28 = vld [vmem:[%s4833_s1 + $0x78] ss:$0 sm:$0xff] }
 0x1a6   : > { %v988_v31 = vmax.f32 %v878_v30, 0.0 }
 0x1a8   : > { %3455 = vmatprep.mubr.msk.f32.mxu1 %vm1017_vm1, %v988_v31 }
 0x1a9   : > { %3456 = vmatmul.mubr.msk.f32.gmra.mrb[12].mxu1 %vm1017_vm1, %v989_v32 }
 0x1aa   : > { %v3404_v33 = vpop.f32.mrb[14].mxu0 }
 0x1ab   : > { %v893_v34 = vadd.f32 %v3404_v33, %v4048_v54  ;;  %v887_v35 = vpop.f32.mrb[15].mxu0 }
 0x1ac   : > { %v888_v36 = vadd.f32 %v4048_v54, %v887_v35 }
 0x1ad   : > { %v991_v38 = vmax.f32 %v893_v34, 0.0 }
 0x1ae   : > { %v990_v37 = vmax.f32 %v888_v36, 0.0 }
 0x1b0   : > { %3458 = vmatprep.mubr.msk.f32.mxu1 %vm1017_vm1, %v990_v37 }
 0x1b1   : > { %3459 = vmatmul.mubr.msk.f32.gmra.mrb[14].mxu1 %vm1017_vm1, %v991_v38 }
 0x1b2   : > { %v3407_v39 = vpop.f32.mrb[16].mxu0 }
 0x1b3   : > { %v903_v40 = vadd.f32 %v3407_v39, %v4048_v54  ;;  %v897_v41 = vpop.f32.mrb[17].mxu0 }
 0x1b4   : > { %v898_v42 = vadd.f32 %v4048_v54, %v897_v41 }
 0x1b5   : > { %v993_v44 = vmax.f32 %v903_v40, 0.0 }
 0x1b6   : > { %v992_v43 = vmax.f32 %v898_v42, 0.0 }
 0x1b8   : > { %3461 = vmatprep.mubr.msk.f32.mxu1 %vm1017_vm1, %v992_v43 }
 0x1b9   : > { %3462 = vmatmul.mubr.msk.f32.gmra.mrb[16].mxu1 %vm1017_vm1, %v993_v44 }
 0x1ba   : > { %v3410_v45 = vpop.f32.mrb[18].mxu0 }
 0x1bb   : > { %v913_v47 = vadd.f32 %v3410_v45, %v4048_v54  ;;  %v907_v50 = vpop.f32.mrb[19].mxu0 }
 0x1bc   : > { %v908_v51 = vadd.f32 %v4048_v54, %v907_v50 }
 0x1bd   : > { %v995_v55 = vmax.f32 %v913_v47, 0.0 }
 0x1be   : > { %v994_v52 = vmax.f32 %v908_v51, 0.0 }
 0x1c0   : > { %3464 = vmatprep.mubr.msk.f32.mxu1 %vm1017_vm1, %v994_v52 }
 0x1c1   : > { %3465 = vmatmul.mubr.msk.f32.gmra.mrb[18].mxu1 %vm1017_vm1, %v995_v55  ;;  %v3745_v55 = vld [vmem:[%s3828_s19 + $0x8] sm:$0xff] }
 0x1c2   : > { %v3413_v56 = vpop.f32.mrb[20].mxu0 }
 0x1c3   : > { %v923_v53 = vadd.f32 %v3413_v56, %v4048_v54  ;;  %v917_v57 = vpop.f32.mrb[21].mxu0 }
 0x1c4   : > { %v918_v58 = vadd.f32 %v4048_v54, %v917_v57  ;;  %v3746_v57 = vld [vmem:[%s3828_s19] sm:$0xff] }
 0x1c5   : > { %v997_v61 = vmax.f32 %v923_v53, 0.0 }
 0x1c6   : > { %v996_v59 = vmax.f32 %v918_v58, 0.0 }
 0x1c8   : > { %3467 = vmatprep.mubr.msk.f32.mxu1 %vm1017_vm1, %v996_v59 }
 0x1c9   : > { %3468 = vmatmul.mubr.msk.f32.gmra.mrb[20].mxu1 %vm1017_vm1, %v997_v61 }
 0x1ca   : > { %v3416_v60 = vpop.f32.mrb[22].mxu0 }
 0x1cb   : > { %v933_v62 = vadd.f32 %v3416_v60, %v4048_v54  ;;  %v927_v63 = vpop.f32.mrb[23].mxu0 }
 0x1cc   : > { %v928_v0 = vadd.f32 %v4048_v54, %v927_v63 }
 0x1cd   : > { %v999_v2 = vmax.f32 %v933_v62, 0.0 }
 0x1ce   : > { %v998_v1 = vmax.f32 %v928_v0, 0.0 }
 0x1d0   : > { %3470 = vmatprep.mubr.msk.f32.mxu1 %vm1017_vm1, %v998_v1 }
 0x1d1   : > { %3471 = vmatmul.mubr.msk.f32.gmra.mrb[22].mxu1 %vm1017_vm1, %v999_v2 }
 0x1d2   : > { %v3419_v3 = vpop.f32.mrb[24].mxu0 }
 0x1d3   : > { %v943_v4 = vadd.f32 %v3419_v3, %v4048_v54  ;;  %v937_v5 = vpop.f32.mrb[25].mxu0 }
 0x1d4   : > { %v938_v7 = vadd.f32 %v4048_v54, %v937_v5 }
 0x1d5   : > { %v1001_v9 = vmax.f32 %v943_v4, 0.0  ;;  %v3747_v4 = vld [vmem:[%s3828_s19 + $0x18] sm:$0xff] }
 0x1d6   : > { %v1000_v8 = vmax.f32 %v938_v7, 0.0 }
 0x1d8   : > { %3473 = vmatprep.mubr.msk.f32.mxu1 %vm1017_vm1, %v1000_v8  ;;  %v3748_v8 = vld [vmem:[%s3828_s19 + $0x10] sm:$0xff] }
 0x1d9   : > { %3474 = vmatmul.mubr.msk.f32.gmra.mrb[24].mxu1 %vm1017_vm1, %v1001_v9 }
 0x1da   : > { %v3422_v10 = vpop.f32.mrb[26].mxu0 }
 0x1db   : > { %v953_v11 = vadd.f32 %v3422_v10, %v4048_v54  ;;  %v947_v12 = vpop.f32.mrb[27].mxu0 }
 0x1dc   : > { %v948_v13 = vadd.f32 %v4048_v54, %v947_v12 }
 0x1dd   : > { %v1003_v15 = vmax.f32 %v953_v11, 0.0 }
 0x1de   : > { %v1002_v14 = vmax.f32 %v948_v13, 0.0 }
 0x1e0   : > { %3476 = vmatprep.mubr.msk.f32.mxu1 %vm1017_vm1, %v1002_v14 }
 0x1e1   : > { %3477 = vmatmul.mubr.msk.f32.gmra.mrb[26].mxu1 %vm1017_vm1, %v1003_v15 }
 0x1e2   : > { %v3425_v16 = vpop.f32.mrb[28].mxu0 }
 0x1e3   : > { %v963_v17 = vadd.f32 %v3425_v16, %v4048_v54  ;;  %v957_v18 = vpop.f32.mrb[29].mxu0 }
 0x1e4   : > { %v958_v19 = vadd.f32 %v4048_v54, %v957_v18 }
 0x1e5   : > { %v1005_v21 = vmax.f32 %v963_v17, 0.0 }
 0x1e6   : > { %v1004_v20 = vmax.f32 %v958_v19, 0.0  ;;  %v3749_v19 = vld [vmem:[%s3828_s19 + $0x28] sm:$0xff] }
 0x1e8   : > { %3479 = vmatprep.mubr.msk.f32.mxu1 %vm1017_vm1, %v1004_v20 }
 0x1e9   : > { %3480 = vmatmul.mubr.msk.f32.gmra.mrb[28].mxu1 %vm1017_vm1, %v1005_v21 }
 0x1ea   : > { %v3428_v22 = vpop.f32.mrb[30].mxu0 }
 0x1eb   : > { %v973_v23 = vadd.f32 %v3428_v22, %v4048_v54  ;;  %v967_v24 = vpop.f32.mrb[31].mxu0  ;;  %v3750_v22 = vld [vmem:[%s3828_s19 + $0x20] sm:$0xff] }
 0x1ec   : > { %v968_v25 = vadd.f32 %v4048_v54, %v967_v24 }
 0x1ed   : > { %v1007_v27 = vmax.f32 %v973_v23, 0.0 }
 0x1ee   : > { %v1006_v26 = vmax.f32 %v968_v25, 0.0 }
 0x1f0   : > { %3482 = vmatprep.mubr.msk.f32.mxu1 %vm1017_vm1, %v1006_v26 }
 0x1f1   : > { %3483 = vmatmul.mubr.msk.f32.gmra.mrb[30].mxu1 %vm1017_vm1, %v1007_v27 }
 0x24c   : > { %v3439_v29 = vpop.f32.mrb[0].mxu1 }
 0x24d   : > { %v4120_v30 = vadd.f32 %v3439_v29, %v4117_v28  ;;  %v1180_v31 = vpop.f32.mrb[1].mxu1 }
 0x24e   : > { %v4123_v32 = vadd.f32 %v4117_v28, %v1180_v31 }
 0x24f   : > { %v1340_v54 = vmul.f32 0.5, %v4120_v30 }
 0x250   : > { %v1339_v33 = vmul.f32 0.5, %v4123_v32 }
 0x251   : > { %v1373_v34 = vmul.f32 1.442695, %v1340_v54 }
 0x252   : > { %v1371_v35 = vmul.f32 1.442695, %v1339_v33 }
 0x253   : > { %3681 = vpow2.f32 %v1373_v34 }
 0x254   : > { %3683 = vpow2.f32 %v1371_v35  ;;  %v3442_v36 = vpop.f32.mrb[2].mxu1  ;;  %v3751_v35 = vld [vmem:[%s3828_s19 + $0x38] sm:$0xff] }
 0x255   : > { %v4128_v37 = vadd.f32 %v3442_v36, %v4117_v28  ;;  %v1190_v38 = vpop.f32.mrb[3].mxu1 }
 0x256   : > { %v4131_v39 = vadd.f32 %v4117_v28, %v1190_v38 }
 0x257   : > { %v1342_v40 = vmul.f32 0.5, %v4128_v37 }
 0x258   : > { %v1341_v41 = vmul.f32 0.5, %v4131_v39 }
 0x259   : > { %v1377_v42 = vmul.f32 1.442695, %v1342_v40  ;;  %v3752_v40 = vld [vmem:[%s3828_s19 + $0x30] sm:$0xff] }
 0x25a   : > { %v1375_v43 = vmul.f32 1.442695, %v1341_v41 }
 0x25b   : > { %3685 = vpow2.f32 %v1377_v42 }
 0x25c   : > { %3687 = vpow2.f32 %v1375_v43  ;;  %v3445_v44 = vpop.f32.mrb[4].mxu1 }
 0x25d   : > { %v3682_v45 = vpop.eup %3681  ;;  %v4136_v47 = vadd.f32 %v3445_v44, %v4117_v28  ;;  %v1200_v50 = vpop.f32.mrb[5].mxu1 }
 0x25e   : > { %v3684_v51 = vpop.eup %3683  ;;  %v4139_v52 = vadd.f32 %v4117_v28, %v1200_v50  ;;  %v1436_v56 = vmul.f32 %v3745_v55, %v3682_v45 }
 0x25f   : > { %v1344_v53 = vmul.f32 0.5, %v4136_v47  ;;  %v1435_v58 = vmul.f32 %v3746_v57, %v3684_v51  ;;  %v3753_v57 = vld [vmem:[%s3828_s19 + $0x48] sm:$0xff] }
 0x260   : > { %v1343_v59 = vmul.f32 0.5, %v4139_v52  ;;  %1501 = vrot.lane.b32.xlu0 %v1436_v56, %s3787_s24 }
 0x261   : > { %v1381_v61 = vmul.f32 1.442695, %v1344_v53  ;;  %1499 = vrot.lane.b32.xlu1 %v1435_v58, %s3787_s24 }
 0x262   : > { %v1379_v60 = vmul.f32 1.442695, %v1343_v59 }
 0x263   : > { %3689 = vpow2.f32 %v1381_v61  ;;  %v3754_v61 = vld [vmem:[%s3828_s19 + $0x40] sm:$0xff] }
 0x264   : > { %3691 = vpow2.f32 %v1379_v60  ;;  %v3448_v62 = vpop.f32.mrb[6].mxu1 }
 0x265   : > { %v3686_v63 = vpop.eup %3685  ;;  %v4148_v0 = vadd.f32 %v3448_v62, %v4117_v28  ;;  %v1210_v1 = vpop.f32.mrb[7].mxu1 }
 0x266   : > { %v3688_v2 = vpop.eup %3687  ;;  %v4151_v3 = vadd.f32 %v4117_v28, %v1210_v1  ;;  %v1438_v5 = vmul.f32 %v3747_v4, %v3686_v63 }
 0x267   : > { %v1346_v7 = vmul.f32 0.5, %v4148_v0  ;;  %v1437_v9 = vmul.f32 %v3748_v8, %v3688_v2 }
 0x268   : > { %v1345_v10 = vmul.f32 0.5, %v4151_v3  ;;  %1505 = vrot.lane.b32.xlu0 %v1438_v5, %s3787_s24 }
 0x269   : > { %v1385_v11 = vmul.f32 1.442695, %v1346_v7  ;;  %1503 = vrot.lane.b32.xlu1 %v1437_v9, %s3787_s24 }
 0x26a   : > { %v1383_v12 = vmul.f32 1.442695, %v1345_v10  ;;  %v3755_v10 = vld [vmem:[%s3828_s19 + $0x58] sm:$0xff] }
 0x26b   : > { %3693 = vpow2.f32 %v1385_v11 }
 0x26c   : > { %3695 = vpow2.f32 %v1383_v12  ;;  %v3451_v13 = vpop.f32.mrb[8].mxu1 }
 0x26d   : > { %v3690_v14 = vpop.eup %3689  ;;  %v4160_v15 = vadd.f32 %v3451_v13, %v4117_v28  ;;  %v1220_v16 = vpop.f32.mrb[9].mxu1  ;;  %v3756_v13 = vld [vmem:[%s3828_s19 + $0x50] sm:$0xff] }
 0x26e   : > { %v3692_v17 = vpop.eup %3691  ;;  %v4163_v18 = vadd.f32 %v4117_v28, %v1220_v16  ;;  %v1440_v20 = vmul.f32 %v3749_v19, %v3690_v14 }
 0x26f   : > { %v1348_v21 = vmul.f32 0.5, %v4160_v15  ;;  %v1439_v23 = vmul.f32 %v3750_v22, %v3692_v17 }
 0x270   : > { %v1347_v24 = vmul.f32 0.5, %v4163_v18  ;;  %1509 = vrot.lane.b32.xlu0 %v1440_v20, %s3787_s24 }
 0x271   : > { %v1389_v25 = vmul.f32 1.442695, %v1348_v21  ;;  %1507 = vrot.lane.b32.xlu1 %v1439_v23, %s3787_s24 }
 0x272   : > { %v1387_v26 = vmul.f32 1.442695, %v1347_v24 }
 0x273   : > { %3697 = vpow2.f32 %v1389_v25 }
 0x274   : > { %3699 = vpow2.f32 %v1387_v26  ;;  %v3454_v27 = vpop.f32.mrb[10].mxu1  ;;  %v3757_v26 = vld [vmem:[%s3828_s19 + $0x68] sm:$0xff] }
 0x275   : > { %v3694_v29 = vpop.eup %3693  ;;  %v4172_v31 = vadd.f32 %v3454_v27, %v4117_v28  ;;  %v1230_v54 = vpop.f32.mrb[11].mxu1 }
 0x276   : > { %v3696_v33 = vpop.eup %3695  ;;  %v4175_v34 = vadd.f32 %v4117_v28, %v1230_v54  ;;  %v1442_v36 = vmul.f32 %v3751_v35, %v3694_v29  ;;  %v3758_v54 = vld [vmem:[%s3828_s19 + $0x60] sm:$0xff] }
 0x277   : > { %v1350_v38 = vmul.f32 0.5, %v4172_v31  ;;  %v1441_v41 = vmul.f32 %v3752_v40, %v3696_v33 }
 0x278   : > { %v1349_v42 = vmul.f32 0.5, %v4175_v34  ;;  %1513 = vrot.lane.b32.xlu0 %v1442_v36, %s3787_s24 }
 0x279   : > { %v1393_v43 = vmul.f32 1.442695, %v1350_v38  ;;  %1511 = vrot.lane.b32.xlu1 %v1441_v41, %s3787_s24 }
 0x27a   : > { %v1391_v44 = vmul.f32 1.442695, %v1349_v42 }
 0x27b   : > { %3701 = vpow2.f32 %v1393_v43 }
 0x27c   : > { %3703 = vpow2.f32 %v1391_v44  ;;  %v3457_v45 = vpop.f32.mrb[12].mxu1 }
 0x27d   : > { %v3698_v50 = vpop.eup %3697  ;;  %v4184_v51 = vadd.f32 %v3457_v45, %v4117_v28  ;;  %v1240_v55 = vpop.f32.mrb[13].mxu1 }
 0x27e   : > { %v3700_v56 = vpop.eup %3699  ;;  %v4187_v53 = vadd.f32 %v4117_v28, %v1240_v55  ;;  %v1444_v58 = vmul.f32 %v3753_v57, %v3698_v50  ;;  %v3759_v50 = vld [vmem:[%s3828_s19 + $0x78] sm:$0xff]  ;;  %v3760_v57 = vld [vmem:[%s3828_s19 + $0x70] sm:$0xff] }
 0x27f   : > { %v1352_v59 = vmul.f32 0.5, %v4184_v51  ;;  %v1443_v60 = vmul.f32 %v3754_v61, %v3700_v56 }
 0x280   : > { %v1351_v62 = vmul.f32 0.5, %v4187_v53  ;;  %1517 = vrot.lane.b32.xlu0 %v1444_v58, %s3787_s24 }
 0x281   : > { %v1397_v63 = vmul.f32 1.442695, %v1352_v59  ;;  %1515 = vrot.lane.b32.xlu1 %v1443_v60, %s3787_s24 }
 0x282   : > { %v1395_v1 = vmul.f32 1.442695, %v1351_v62 }
 0x283   : > { %3705 = vpow2.f32 %v1397_v63 }
 0x284   : > { %3707 = vpow2.f32 %v1395_v1  ;;  %v3460_v2 = vpop.f32.mrb[14].mxu1 }
 0x285   : > { %v3702_v4 = vpop.eup %3701  ;;  %v4196_v5 = vadd.f32 %v3460_v2, %v4117_v28  ;;  %v1250_v7 = vpop.f32.mrb[15].mxu1 }
 0x286   : > { %v3704_v8 = vpop.eup %3703  ;;  %v4199_v9 = vadd.f32 %v4117_v28, %v1250_v7  ;;  %v1446_v11 = vmul.f32 %v3755_v10, %v3702_v4 }
 0x287   : > { %v1354_v12 = vmul.f32 0.5, %v4196_v5  ;;  %v1445_v14 = vmul.f32 %v3756_v13, %v3704_v8  ;;  %v3761_v8 = vld [vmem:[%s3828_s19 + $0x88] sm:$0xff] }
 0x288   : > { %v1353_v16 = vmul.f32 0.5, %v4199_v9  ;;  %1521 = vrot.lane.b32.xlu0 %v1446_v11, %s3787_s24 }
 0x289   : > { %v1401_v17 = vmul.f32 1.442695, %v1354_v12  ;;  %1519 = vrot.lane.b32.xlu1 %v1445_v14, %s3787_s24  ;;  %v3762_v12 = vld [vmem:[%s3828_s19 + $0x80] sm:$0xff] }
 0x28a   : > { %v1399_v19 = vmul.f32 1.442695, %v1353_v16 }
 0x28b   : > { %3709 = vpow2.f32 %v1401_v17 }
 0x28c   : > { %3711 = vpow2.f32 %v1399_v19  ;;  %v3463_v20 = vpop.f32.mrb[16].mxu1 }
 0x28d   : > { %v3706_v21 = vpop.eup %3705  ;;  %v4208_v22 = vadd.f32 %v3463_v20, %v4117_v28  ;;  %v1260_v23 = vpop.f32.mrb[17].mxu1 }
 0x28e   : > { %v3708_v24 = vpop.eup %3707  ;;  %v4211_v25 = vadd.f32 %v4117_v28, %v1260_v23  ;;  %v1448_v27 = vmul.f32 %v3757_v26, %v3706_v21 }
 0x28f   : > { %v1356_v29 = vmul.f32 0.5, %v4208_v22  ;;  %v1447_v33 = vmul.f32 %v3758_v54, %v3708_v24 }
 0x290   : > { %v1355_v35 = vmul.f32 0.5, %v4211_v25  ;;  %1525 = vrot.lane.b32.xlu0 %v1448_v27, %s3787_s24  ;;  %v3763_v27 = vld [vmem:[%s3828_s19 + $0x98] sm:$0xff] }
 0x291   : > { %v1405_v36 = vmul.f32 1.442695, %v1356_v29  ;;  %1523 = vrot.lane.b32.xlu1 %v1447_v33, %s3787_s24  ;;  %v3764_v33 = vld [vmem:[%s3828_s19 + $0x90] sm:$0xff] }
 0x292   : > { %v1403_v38 = vmul.f32 1.442695, %v1355_v35 }
 0x293   : > { %3713 = vpow2.f32 %v1405_v36 }
 0x294   : > { %3715 = vpow2.f32 %v1403_v38  ;;  %v3466_v40 = vpop.f32.mrb[18].mxu1 }
 0x295   : > { %v3710_v41 = vpop.eup %3709  ;;  %v4220_v42 = vadd.f32 %v3466_v40, %v4117_v28  ;;  %v1270_v43 = vpop.f32.mrb[19].mxu1 }
 0x296   : > { %v3712_v44 = vpop.eup %3711  ;;  %v4223_v45 = vadd.f32 %v4117_v28, %v1270_v43  ;;  %v1450_v55 = vmul.f32 %v3759_v50, %v3710_v41 }
 0x297   : > { %v1358_v56 = vmul.f32 0.5, %v4220_v42  ;;  %v1449_v58 = vmul.f32 %v3760_v57, %v3712_v44  ;;  %v3765_v57 = vld [vmem:[%s3828_s19 + $0xa8] sm:$0xff] }
 0x298   : > { %v1357_v59 = vmul.f32 0.5, %v4223_v45  ;;  %1529 = vrot.lane.b32.xlu0 %v1450_v55, %s3787_s24 }
 0x299   : > { %v1409_v61 = vmul.f32 1.442695, %v1358_v56  ;;  %1527 = vrot.lane.b32.xlu1 %v1449_v58, %s3787_s24 }
 0x29a   : > { %v1407_v60 = vmul.f32 1.442695, %v1357_v59 }
 0x29b   : > { %3717 = vpow2.f32 %v1409_v61  ;;  %v3766_v61 = vld [vmem:[%s3828_s19 + $0xa0] sm:$0xff] }
 0x29c   : > { %3719 = vpow2.f32 %v1407_v60  ;;  %v3469_v62 = vpop.f32.mrb[20].mxu1 }
 0x29d   : > { %v3714_v63 = vpop.eup %3713  ;;  %v4232_v1 = vadd.f32 %v3469_v62, %v4117_v28  ;;  %v1280_v2 = vpop.f32.mrb[21].mxu1 }
 0x29e   : > { %v3716_v4 = vpop.eup %3715  ;;  %v4235_v7 = vadd.f32 %v4117_v28, %v1280_v2  ;;  %v1452_v10 = vmul.f32 %v3761_v8, %v3714_v63 }
 0x29f   : > { %v1360_v11 = vmul.f32 0.5, %v4232_v1  ;;  %v1451_v13 = vmul.f32 %v3762_v12, %v3716_v4 }
 0x2a0   : > { %v1359_v14 = vmul.f32 0.5, %v4235_v7  ;;  %1533 = vrot.lane.b32.xlu0 %v1452_v10, %s3787_s24 }
 0x2a1   : > { %v1413_v16 = vmul.f32 1.442695, %v1360_v11  ;;  %1531 = vrot.lane.b32.xlu1 %v1451_v13, %s3787_s24 }
 0x2a2   : > { %v1411_v17 = vmul.f32 1.442695, %v1359_v14  ;;  %v3767_v14 = vld [vmem:[%s3828_s19 + $0xb8] sm:$0xff] }
 0x2a3   : > { %3721 = vpow2.f32 %v1413_v16 }
 0x2a4   : > { %3723 = vpow2.f32 %v1411_v17  ;;  %v3472_v19 = vpop.f32.mrb[22].mxu1 }
 0x2a5   : > { %v3718_v20 = vpop.eup %3717  ;;  %v4244_v21 = vadd.f32 %v3472_v19, %v4117_v28  ;;  %v1290_v23 = vpop.f32.mrb[23].mxu1  ;;  %v3768_v19 = vld [vmem:[%s3828_s19 + $0xb0] sm:$0xff] }
 0x2a6   : > { %v3720_v24 = vpop.eup %3719  ;;  %v4247_v26 = vadd.f32 %v4117_v28, %v1290_v23  ;;  %v1454_v29 = vmul.f32 %v3763_v27, %v3718_v20 }
 0x2a7   : > { %v1362_v54 = vmul.f32 0.5, %v4244_v21  ;;  %v1453_v35 = vmul.f32 %v3764_v33, %v3720_v24 }
 0x2a8   : > { %v1361_v36 = vmul.f32 0.5, %v4247_v26  ;;  %1537 = vrot.lane.b32.xlu0 %v1454_v29, %s3787_s24 }
 0x2a9   : > { %v1417_v38 = vmul.f32 1.442695, %v1362_v54  ;;  %1535 = vrot.lane.b32.xlu1 %v1453_v35, %s3787_s24 }
 0x2aa   : > { %v1415_v40 = vmul.f32 1.442695, %v1361_v36 }
 0x2ab   : > { %3725 = vpow2.f32 %v1417_v38 }
 0x2ac   : > { %3727 = vpow2.f32 %v1415_v40  ;;  %v3475_v41 = vpop.f32.mrb[24].mxu1  ;;  %v3769_v40 = vld [vmem:[%s3828_s19 + $0xc8] sm:$0xff] }
 0x2ad   : > { %v3722_v43 = vpop.eup %3721  ;;  %v4256_v44 = vadd.f32 %v3475_v41, %v4117_v28  ;;  %v1300_v50 = vpop.f32.mrb[25].mxu1 }
 0x2ae   : > { %v3724_v55 = vpop.eup %3723  ;;  %v4259_v56 = vadd.f32 %v4117_v28, %v1300_v50  ;;  %v1456_v58 = vmul.f32 %v3765_v57, %v3722_v43  ;;  %v3770_v50 = vld [vmem:[%s3828_s19 + $0xc0] sm:$0xff] }
 0x2af   : > { %v1364_v59 = vmul.f32 0.5, %v4256_v44  ;;  %v1455_v60 = vmul.f32 %v3766_v61, %v3724_v55 }
 0x2b0   : > { %v1363_v62 = vmul.f32 0.5, %v4259_v56  ;;  %1541 = vrot.lane.b32.xlu0 %v1456_v58, %s3787_s24 }
 0x2b1   : > { %v1421_v63 = vmul.f32 1.442695, %v1364_v59  ;;  %1539 = vrot.lane.b32.xlu1 %v1455_v60, %s3787_s24 }
 0x2b2   : > { %v1419_v2 = vmul.f32 1.442695, %v1363_v62 }
 0x2b3   : > { %3729 = vpow2.f32 %v1421_v63 }
 0x2b4   : > { %3731 = vpow2.f32 %v1419_v2  ;;  %v3478_v4 = vpop.f32.mrb[26].mxu1 }
 0x2b5   : > { %v3726_v8 = vpop.eup %3725  ;;  %v4268_v10 = vadd.f32 %v3478_v4, %v4117_v28  ;;  %v1310_v11 = vpop.f32.mrb[27].mxu1 }
 0x2b6   : > { %v3728_v12 = vpop.eup %3727  ;;  %v4271_v13 = vadd.f32 %v4117_v28, %v1310_v11  ;;  %v1458_v16 = vmul.f32 %v3767_v14, %v3726_v8  ;;  %v3771_v8 = vld [vmem:[%s3828_s19 + $0xd8] sm:$0xff]  ;;  %v3772_v14 = vld [vmem:[%s3828_s19 + $0xd0] sm:$0xff] }
 0x2b7   : > { %v1366_v17 = vmul.f32 0.5, %v4268_v10  ;;  %v1457_v20 = vmul.f32 %v3768_v19, %v3728_v12 }
 0x2b8   : > { %v1365_v23 = vmul.f32 0.5, %v4271_v13  ;;  %1545 = vrot.lane.b32.xlu0 %v1458_v16, %s3787_s24 }
 0x2b9   : > { %v1425_v24 = vmul.f32 1.442695, %v1366_v17  ;;  %1543 = vrot.lane.b32.xlu1 %v1457_v20, %s3787_s24 }
 0x2ba   : > { %v1423_v27 = vmul.f32 1.442695, %v1365_v23 }
 0x2bb   : > { %3733 = vpow2.f32 %v1425_v24  ;;  %v3773_v24 = vld [vmem:[%s3828_s19 + $0xe8] sm:$0xff] }
 0x2bc   : > { %3735 = vpow2.f32 %v1423_v27  ;;  %v3481_v29 = vpop.f32.mrb[28].mxu1 }
 0x2bd   : > { %v3730_v54 = vpop.eup %3729  ;;  %v4280_v33 = vadd.f32 %v3481_v29, %v4117_v28  ;;  %v1320_v35 = vpop.f32.mrb[29].mxu1  ;;  %v3774_v29 = vld [vmem:[%s3828_s19 + $0xe0] sm:$0xff] }
 0x2be   : > { %v3732_v36 = vpop.eup %3731  ;;  %v4283_v38 = vadd.f32 %v4117_v28, %v1320_v35  ;;  %v1460_v41 = vmul.f32 %v3769_v40, %v3730_v54 }
 0x2bf   : > { %v1368_v43 = vmul.f32 0.5, %v4280_v33  ;;  %v1459_v55 = vmul.f32 %v3770_v50, %v3732_v36 }
 0x2c0   : > { %v1367_v57 = vmul.f32 0.5, %v4283_v38  ;;  %1549 = vrot.lane.b32.xlu0 %v1460_v41, %s3787_s24 }
 0x2c1   : > { %v1429_v58 = vmul.f32 1.442695, %v1368_v43  ;;  %1547 = vrot.lane.b32.xlu1 %v1459_v55, %s3787_s24  ;;  %v3775_v43 = vld [vmem:[%s3828_s19 + $0xf8] sm:$0xff] }
 0x2c2   : > { %v1427_v59 = vmul.f32 1.442695, %v1367_v57 }
 0x2c3   : > { %3737 = vpow2.f32 %v1429_v58 }
 0x2c4   : > { %3739 = vpow2.f32 %v1427_v59  ;;  %v3484_v61 = vpop.f32.mrb[30].mxu1  ;;  %v3776_v59 = vld [vmem:[%s3828_s19 + $0xf0] sm:$0xff] }
 0x2c5   : > { %v3734_v60 = vpop.eup %3733  ;;  %v4292_v62 = vadd.f32 %v3484_v61, %v4117_v28  ;;  %v1330_v63 = vpop.f32.mrb[31].mxu1 }
 0x2c6   : > { %v3736_v2 = vpop.eup %3735  ;;  %v4295_v4 = vadd.f32 %v4117_v28, %v1330_v63  ;;  %v1462_v11 = vmul.f32 %v3771_v8, %v3734_v60 }
 0x2c7   : > { %v1370_v12 = vmul.f32 0.5, %v4292_v62  ;;  %v1461_v16 = vmul.f32 %v3772_v14, %v3736_v2 }
 0x2c8   : > { %v1369_v17 = vmul.f32 0.5, %v4295_v4  ;;  %1553 = vrot.lane.b32.xlu0 %v1462_v11, %s3787_s24  ;;  %v2089_v11 = vld [vmem:[%s4833_s1 + $0x90] sm:$0xff] }
 0x2c9   : > { %v1433_v19 = vmul.f32 1.442695, %v1370_v12  ;;  %1551 = vrot.lane.b32.xlu1 %v1461_v16, %s3787_s24  ;;  %v2090_v12 = vld [vmem:[%s4833_s1 + $0x98] sm:$0xff] }
 0x2ca   : > { %v1431_v20 = vmul.f32 1.442695, %v1369_v17  ;;  %v3629_v16 = vpack.c.bf16 %v2090_v12, %v2089_v11 }
 0x2cb   : > { %3741 = vpow2.f32 %v1433_v19  ;;  %v2091_v19 = vld [vmem:[%s4833_s1 + $0xa0] sm:$0xff] }
 0x2cc   : > { %3743 = vpow2.f32 %v1431_v20  ;;  %3630 = vmatprep.subr.bf16.mxu1 %v3629_v16  ;;  %v2092_v20 = vld [vmem:[%s4833_s1 + $0xa8] sm:$0xff] }
 0x2cd   : > { %v3738_v23 = vpop.eup %3737  ;;  %3632 = vmatpush3.bf16.msra.mxu1 %v3629_v16 }
 0x2ce   : > { %v3740_v28 = vpop.eup %3739  ;;  %v1464_v27 = vmul.f32 %v3773_v24, %v3738_v23 }
 0x2cf   : > { %v1463_v54 = vmul.f32 %v3774_v29, %v3740_v28  ;;  %v3633_v28 = vpack.c.bf16 %v2092_v20, %v2091_v19 }
 0x2d0   : > { %1557 = vrot.lane.b32.xlu0 %v1464_v27, %s3787_s24 }
 0x2d1   : > { %1555 = vrot.lane.b32.xlu1 %v1463_v54, %s3787_s24  ;;  %3634 = vmatprep.subr.bf16.mxu1 %v3633_v28 }
 0x2d2   : > { %v1502_v35 = vpop.permute.xlu0 %1501  ;;  %3636 = vmatpush3.bf16.msra.mxu1 %v3633_v28 }
 0x2d3   : > { %v1596_v36 = vadd.f32 %v1502_v35, %v4120_v30  ;;  %v1500_v40 = vpop.permute.xlu1 %1499 }
 0x2d4   : > { %v1595_v57 = vadd.f32 %v1500_v40, %v4123_v32 }
 0x2d5   : > { %v3742_v41 = vpop.eup %3741  ;;  %1636 = vperm.xlu0 %3678, %v1596_v36  }
 0x2d6   : > { %v1466_v50 = vmul.f32 %v3775_v43, %v3742_v41  ;;  %v3744_v55 = vpop.eup %3743 }
 0x2d7   : > { %v1465_v61 = vmul.f32 %v3776_v59, %v3744_v55 }
 0x2d8   : > { %1561 = vrot.lane.b32.xlu1 %v1466_v50, %s3787_s24 }
 0x2d9   : > { %1631 = vperm.xlu0 %3678, %v1595_v57  }
 0x2da   : > { %v1506_v58 = vpop.permute.xlu0 %1505 }
 0x2db   : > { %v1598_v60 = vadd.f32 %v1506_v58, %v4128_v37  ;;  %v1504_v63 = vpop.permute.xlu1 %1503 }
 0x2dc   : > { %1559 = vrot.lane.b32.xlu1 %v1465_v61, %s3787_s24  ;;  %v1597_v2 = vadd.f32 %v1504_v63, %v4131_v39 }
 0x2dd   : > { %1646 = vperm.xlu0 %3678, %v1598_v60  }
 0x2e0   : > { %1830 = vperm.xlu1 %3679, %v1596_v36  }
 0x2e1   : > { %1641 = vperm.xlu0 %3678, %v1597_v2  }
 0x2e2   : > { %v1510_v8 = vpop.permute.xlu0 %1509 }
 0x2e3   : > { %v1600_v14 = vadd.f32 %v1510_v8, %v4136_v47  ;;  %v1508_v17 = vpop.permute.xlu1 %1507 }
 0x2e4   : > { %1826 = vperm.xlu1 %3679, %v1595_v57   ;;  %v1599_v23 = vadd.f32 %v1508_v17, %v4139_v52 }
 0x2e5   : > { %1656 = vperm.xlu0 %3678, %v1600_v14  }
 0x2e8   : > { %1838 = vperm.xlu1 %3679, %v1598_v60  }
 0x2e9   : > { %1651 = vperm.xlu0 %3678, %v1599_v23  }
 0x2ea   : > { %v1514_v24 = vpop.permute.xlu0 %1513 }
 0x2eb   : > { %v1602_v27 = vadd.f32 %v1514_v24, %v4148_v0  ;;  %v1512_v29 = vpop.permute.xlu1 %1511 }
 0x2ec   : > { %1834 = vperm.xlu1 %3679, %v1597_v2   ;;  %v1601_v54 = vadd.f32 %v1512_v29, %v4151_v3 }
 0x2ed   : > { %1666 = vperm.xlu0 %3678, %v1602_v27  }
 0x2f0   : > { %1846 = vperm.xlu1 %3679, %v1600_v14  }
 0x2f1   : > { %1661 = vperm.xlu0 %3678, %v1601_v54  }
 0x2f2   : > { %v1518_v35 = vpop.permute.xlu0 %1517 }
 0x2f3   : > { %v1604_v36 = vadd.f32 %v1518_v35, %v4160_v15  ;;  %v1516_v40 = vpop.permute.xlu1 %1515 }
 0x2f4   : > { %1842 = vperm.xlu1 %3679, %v1599_v23   ;;  %v1603_v41 = vadd.f32 %v1516_v40, %v4163_v18 }
 0x2f5   : > { %1676 = vperm.xlu0 %3678, %v1604_v36  }
 0x2f8   : > { %1854 = vperm.xlu1 %3679, %v1602_v27  }
 0x2f9   : > { %1671 = vperm.xlu0 %3678, %v1603_v41  }
 0x2fa   : > { %v1522_v43 = vpop.permute.xlu0 %1521 }
 0x2fb   : > { %v1606_v50 = vadd.f32 %v1522_v43, %v4172_v31  ;;  %v1520_v55 = vpop.permute.xlu1 %1519 }
 0x2fc   : > { %1850 = vperm.xlu1 %3679, %v1601_v54   ;;  %v1605_v57 = vadd.f32 %v1520_v55, %v4175_v34 }
 0x2fd   : > { %1686 = vperm.xlu0 %3678, %v1606_v50  }
 0x300   : > { %1862 = vperm.xlu1 %3679, %v1604_v36  }
 0x301   : > { %1681 = vperm.xlu0 %3678, %v1605_v57  }
 0x302   : > { %v1526_v58 = vpop.permute.xlu0 %1525 }
 0x303   : > { %v1608_v59 = vadd.f32 %v1526_v58, %v4184_v51  ;;  %v1524_v61 = vpop.permute.xlu1 %1523 }
 0x304   : > { %1858 = vperm.xlu1 %3679, %v1603_v41   ;;  %v1607_v60 = vadd.f32 %v1524_v61, %v4187_v53 }
 0x305   : > { %1696 = vperm.xlu0 %3678, %v1608_v59  }
 0x308   : > { %1870 = vperm.xlu1 %3679, %v1606_v50  }
 0x309   : > { %1691 = vperm.xlu0 %3678, %v1607_v60  }
 0x30a   : > { %v1530_v63 = vpop.permute.xlu0 %1529 }
 0x30b   : > { %v1610_v2 = vadd.f32 %v1530_v63, %v4196_v5  ;;  %v1528_v8 = vpop.permute.xlu1 %1527 }
 0x30c   : > { %1866 = vperm.xlu1 %3679, %v1605_v57   ;;  %v1609_v11 = vadd.f32 %v1528_v8, %v4199_v9 }
 0x30d   : > { %1706 = vperm.xlu0 %3678, %v1610_v2  }
 0x310   : > { %1878 = vperm.xlu1 %3679, %v1608_v59  }
 0x311   : > { %1701 = vperm.xlu0 %3678, %v1609_v11  }
 0x312   : > { %v1534_v12 = vpop.permute.xlu0 %1533 }
 0x313   : > { %v1612_v14 = vadd.f32 %v1534_v12, %v4208_v22  ;;  %v1532_v16 = vpop.permute.xlu1 %1531 }
 0x314   : > { %1874 = vperm.xlu1 %3679, %v1607_v60   ;;  %v1611_v17 = vadd.f32 %v1532_v16, %v4211_v25 }
 0x315   : > { %1716 = vperm.xlu0 %3678, %v1612_v14  }
 0x318   : > { %1886 = vperm.xlu1 %3679, %v1610_v2  }
 0x319   : > { %1711 = vperm.xlu0 %3678, %v1611_v17  }
 0x31a   : > { %v1538_v19 = vpop.permute.xlu0 %1537 }
 0x31b   : > { %v1614_v20 = vadd.f32 %v1538_v19, %v4220_v42  ;;  %v1536_v23 = vpop.permute.xlu1 %1535 }
 0x31c   : > { %1882 = vperm.xlu1 %3679, %v1609_v11   ;;  %v1613_v28 = vadd.f32 %v1536_v23, %v4223_v45  ;;  %v1627_v23 = vld [vmem:[%s4833_s1 + $0x80] sm:$0x3] }
 0x31d   : > { %1726 = vperm.xlu0 %3678, %v1614_v20  }
 0x320   : > { %1894 = vperm.xlu1 %3679, %v1612_v14  }
 0x321   : > { %1721 = vperm.xlu0 %3678, %v1613_v28  }
 0x322   : > { %v1542_v24 = vpop.permute.xlu0 %1541 }
 0x323   : > { %v1616_v27 = vadd.f32 %v1542_v24, %v4232_v1  ;;  %v1540_v29 = vpop.permute.xlu1 %1539  ;;  %v4363_v24 = vrot.slane %v1627_v23, %v507_v49 }
 0x324   : > { %1890 = vperm.xlu1 %3679, %v1611_v17   ;;  %v1615_v54 = vadd.f32 %v1540_v29, %v4235_v7 }
 0x325   : > { %1736 = vperm.xlu0 %3678, %v1616_v27  }
 0x328   : > { %1902 = vperm.xlu1 %3679, %v1614_v20  }
 0x329   : > { %1731 = vperm.xlu0 %3678, %v1615_v54  }
 0x32a   : > { %v1546_v35 = vpop.permute.xlu0 %1545 }
 0x32b   : > { %v1618_v36 = vadd.f32 %v1546_v35, %v4244_v21  ;;  %v1544_v40 = vpop.permute.xlu1 %1543 }
 0x32c   : > { %1898 = vperm.xlu1 %3679, %v1613_v28   ;;  %v1617_v41 = vadd.f32 %v1544_v40, %v4247_v26 }
 0x32d   : > { %1746 = vperm.xlu0 %3678, %v1618_v36  }
 0x330   : > { %1910 = vperm.xlu1 %3679, %v1616_v27   ;;  %v4367_v27 = vrot.slane %v1627_v23, %v343_v48  ;;  %v4381_v48 = vld [vmem:[%s4833_s1 + $0x88] ss:$0 sm:$0xff] }
 0x331   : > { %1741 = vperm.xlu0 %3678, %v1617_v41  }
 0x332   : > { %v1550_v43 = vpop.permute.xlu0 %1549 }
 0x333   : > { %v1620_v50 = vadd.f32 %v1550_v43, %v4256_v44  ;;  %v1548_v55 = vpop.permute.xlu1 %1547 }
 0x334   : > { %1906 = vperm.xlu1 %3679, %v1615_v54   ;;  %v1619_v57 = vadd.f32 %v1548_v55, %v4259_v56 }
 0x335   : > { %1756 = vperm.xlu0 %3678, %v1620_v50  }
 0x338   : > { %1918 = vperm.xlu1 %3679, %v1618_v36  }
 0x339   : > { %1751 = vperm.xlu0 %3678, %v1619_v57  }
 0x33a   : > { %v1554_v58 = vpop.permute.xlu0 %1553 }
 0x33b   : > { %v1622_v59 = vadd.f32 %v1554_v58, %v4268_v10  ;;  %v1552_v61 = vpop.permute.xlu1 %1551 }
 0x33c   : > { %1914 = vperm.xlu1 %3679, %v1617_v41   ;;  %v1621_v60 = vadd.f32 %v1552_v61, %v4271_v13 }
 0x33d   : > { %1766 = vperm.xlu0 %3678, %v1622_v59  }
 0x340   : > { %1926 = vperm.xlu1 %3679, %v1620_v50  }
 0x341   : > { %1761 = vperm.xlu0 %3678, %v1621_v60  }
 0x342   : > { %v1558_v63 = vpop.permute.xlu0 %1557 }
 0x343   : > { %v1624_v2 = vadd.f32 %v1558_v63, %v4280_v33  ;;  %v1556_v8 = vpop.permute.xlu1 %1555 }
 0x344   : > { %1922 = vperm.xlu1 %3679, %v1619_v57   ;;  %v1623_v11 = vadd.f32 %v1556_v8, %v4283_v38 }
 0x345   : > { %1776 = vperm.xlu0 %3678, %v1624_v2  }
 0x348   : > { %1934 = vperm.xlu1 %3679, %v1622_v59  }
 0x349   : > { %1771 = vperm.xlu0 %3678, %v1623_v11  }
 0x34a   : > { %v1562_v12 = vpop.permute.xlu1 %1561 }
 0x34b   : > { %v1626_v17 = vadd.f32 %v1562_v12, %v4292_v62 }
 0x34c   : > { %1930 = vperm.xlu1 %3679, %v1621_v60  }
 0x34e   : > { %v1560_v14 = vpop.permute.xlu1 %1559 }
 0x34f   : > { %v1625_v16 = vadd.f32 %v1560_v14, %v4295_v4 }
 0x350   : > { %1942 = vperm.xlu1 %3679, %v1624_v2  }
 0x351   : > { %1781 = vperm.xlu0 %3678, %v1625_v16  }
 0x354   : > { %1938 = vperm.xlu1 %3679, %v1623_v11   ;;  %v1637_v19 = vpop.permute.xlu0 %1636 }
 0x355   : > { %1786 = vperm.xlu0 %3678, %v1626_v17   ;;  %v1794_v54 = vmul.f32 %v4367_v27, %v1637_v19 }
 0x358   : > { %1946 = vperm.xlu1 %3679, %v1625_v16   ;;  %v1632_v20 = vpop.permute.xlu0 %1631 }
 0x359   : > { %2817 = vrot.lane.b32.xlu0 %v4123_v32, %s3788_s4  ;;  %v1793_v46 = vmul.f32 %v4367_v27, %v1632_v20 }
 0x35a   : > { %3680 = vset.pattern.permute.xlu0 %v3786_v6 }
 0x35c   : > { %1950 = vperm.xlu1 %3679, %v1626_v17   ;;  %v1647_v28 = vpop.permute.xlu0 %1646 }
 0x35d   : > { %2821 = vrot.lane.b32.xlu0 %v4131_v39, %s3788_s4  ;;  %v1796_v55 = vmul.f32 %v4367_v27, %v1647_v28 }
 0x35f   : > { %v1831_v32 = vpop.permute.xlu1 %1830 }
 0x360   : > { %v1958_v29 = vmul.f32 %v4363_v24, %v1831_v32  ;;  %2819 = vrot.lane.b32.xlu1 %v4120_v30, %s3788_s4  ;;  %v1642_v6 = vpop.permute.xlu0 %1641 }
 0x361   : > { %2825 = vrot.lane.b32.xlu0 %v4139_v52, %s3788_s4  ;;  %v1795_v59 = vmul.f32 %v4367_v27, %v1642_v6 }
 0x362   : > { %v1990_v49 = vadd.f32 %v1958_v29, %v1794_v54 }
 0x363   : > { %v1827_v35 = vpop.permute.xlu1 %1826 }
 0x364   : > { %v1957_v39 = vmul.f32 %v4363_v24, %v1827_v35  ;;  %2823 = vrot.lane.b32.xlu1 %v4128_v37, %s3788_s4  ;;  %v1657_v30 = vpop.permute.xlu0 %1656  ;;  %v2026_v52 = vadd.f32 %v4381_v48, %v1990_v49 }
 0x365   : > { %2829 = vrot.lane.b32.xlu0 %v4151_v3, %s3788_s4  ;;  %v1798_v11 = vmul.f32 %v4367_v27, %v1657_v30 }
 0x366   : > { %v1989_v36 = vadd.f32 %v1957_v39, %v1793_v46  ;;  %v2058_v57 = vmax.f32 %v2026_v52, 0.0 }
 0x367   : > { %v1839_v40 = vpop.permute.xlu1 %1838 }
 0x368   : > { %v2025_v41 = vadd.f32 %v4381_v48, %v1989_v36  ;;  %v1960_v43 = vmul.f32 %v4363_v24, %v1839_v40  ;;  %2827 = vrot.lane.b32.xlu1 %v4136_v47, %s3788_s4  ;;  %v1652_v50 = vpop.permute.xlu0 %1651 }
 0x369   : > { %2833 = vrot.lane.b32.xlu0 %v4163_v18, %s3788_s4  ;;  %v1797_v17 = vmul.f32 %v4367_v27, %v1652_v50 }
 0x36a   : > { %v2057_v37 = vmax.f32 %v2025_v41, 0.0  ;;  %v1992_v3 = vadd.f32 %v1960_v43, %v1796_v55 }
 0x36b   : > { %v1835_v58 = vpop.permute.xlu1 %1834 }
 0x36c   : > { %v1959_v61 = vmul.f32 %v4363_v24, %v1835_v58  ;;  %2831 = vrot.lane.b32.xlu1 %v4148_v0, %s3788_s4  ;;  %3493 = vmatprep.mubr.msk.f32.mxu1 %vm1017_vm1, %v2057_v37  ;;  %v1667_v47 = vpop.permute.xlu0 %1666  ;;  %v2028_v60 = vadd.f32 %v4381_v48, %v1992_v3 }
 0x36d   : > { %2837 = vrot.lane.b32.xlu0 %v4175_v34, %s3788_s4  ;;  %3494 = vmatmul.mubr.msk.f32.vlgmr.msra.gmra.mrb[32].mxu1 %vm1017_vm1, %v2058_v57  ;;  %v1800_v29 = vmul.f32 %v4367_v27, %v1667_v47 }
 0x36e   : > { %v1991_v18 = vadd.f32 %v1959_v61, %v1795_v59  ;;  %v2060_v12 = vmax.f32 %v2028_v60, 0.0 }
 0x36f   : > { %v1847_v63 = vpop.permute.xlu1 %1846 }
 0x370   : > { %v2027_v2 = vadd.f32 %v4381_v48, %v1991_v18  ;;  %v1962_v8 = vmul.f32 %v4363_v24, %v1847_v63  ;;  %2835 = vrot.lane.b32.xlu1 %v4160_v15, %s3788_s4  ;;  %v1662_v0 = vpop.permute.xlu0 %1661 }
 0x371   : > { %2841 = vrot.lane.b32.xlu0 %v4187_v53, %s3788_s4  ;;  %v1799_v35 = vmul.f32 %v4367_v27, %v1662_v0 }
 0x372   : > { %v2059_v34 = vmax.f32 %v2027_v2, 0.0  ;;  %v1994_v14 = vadd.f32 %v1962_v8, %v1798_v11 }
 0x373   : > { %v1843_v16 = vpop.permute.xlu1 %1842 }
 0x374   : > { %v1961_v19 = vmul.f32 %v4363_v24, %v1843_v16  ;;  %2839 = vrot.lane.b32.xlu1 %v4172_v31, %s3788_s4  ;;  %3496 = vmatprep.mubr.msk.f32.mxu1 %vm1017_vm1, %v2059_v34  ;;  %v1677_v15 = vpop.permute.xlu0 %1676  ;;  %v2030_v20 = vadd.f32 %v4381_v48, %v1994_v14 }
 0x375   : > { %2845 = vrot.lane.b32.xlu0 %v4199_v9, %s3788_s4  ;;  %3497 = vmatmul.mubr.msk.f32.gmra.mrb[34].mxu1 %vm1017_vm1, %v2060_v12  ;;  %v1802_v40 = vmul.f32 %v4367_v27, %v1677_v15 }
 0x376   : > { %v1993_v53 = vadd.f32 %v1961_v19, %v1797_v17  ;;  %v2062_v6 = vmax.f32 %v2030_v20, 0.0 }
 0x377   : > { %v1855_v23 = vpop.permute.xlu1 %1854 }
 0x378   : > { %v2029_v28 = vadd.f32 %v4381_v48, %v1993_v53  ;;  %v1964_v32 = vmul.f32 %v4363_v24, %v1855_v23  ;;  %2843 = vrot.lane.b32.xlu1 %v4184_v51, %s3788_s4  ;;  %v1672_v31 = vpop.permute.xlu0 %1671 }
 0x379   : > { %2849 = vrot.lane.b32.xlu0 %v4211_v25, %s3788_s4  ;;  %v1801_v55 = vmul.f32 %v4367_v27, %v1672_v31 }
 0x37a   : > { %v2061_v9 = vmax.f32 %v2029_v28, 0.0  ;;  %v1996_v54 = vadd.f32 %v1964_v32, %v1800_v29 }
 0x37b   : > { %v1851_v49 = vpop.permute.xlu1 %1850 }
 0x37c   : > { %v1963_v46 = vmul.f32 %v4363_v24, %v1851_v49  ;;  %2847 = vrot.lane.b32.xlu1 %v4196_v5, %s3788_s4  ;;  %3499 = vmatprep.mubr.msk.f32.mxu1 %vm1017_vm1, %v2061_v9  ;;  %v1687_v51 = vpop.permute.xlu0 %1686  ;;  %v2032_v39 = vadd.f32 %v4381_v48, %v1996_v54  ;;  %v2452_v54 = vld [vmem:[%s4833_s1 + $0xc0] sm:$0xff]  ;;  %v2453_v49 = vld [vmem:[%s4833_s1 + $0xc8] sm:$0xff] }
 0x37d   : > { %2853 = vrot.lane.b32.xlu0 %v4223_v45, %s3788_s4  ;;  %3500 = vmatmul.mubr.msk.f32.gmra.mrb[36].mxu1 %vm1017_vm1, %v2062_v6  ;;  %v1804_v61 = vmul.f32 %v4367_v27, %v1687_v51  ;;  %v2451_v6 = vld [vmem:[%s4833_s1 + $0xb8] sm:$0xff] }
 0x37e   : > { %v1995_v25 = vadd.f32 %v1963_v46, %v1799_v35  ;;  %v2064_v41 = vmax.f32 %v2032_v39, 0.0  ;;  %v3637_v51 = vpack.c.bf16 %v2452_v54, %v2451_v6 }
 0x37f   : > { %v1863_v30 = vpop.permute.xlu1 %1862 }
 0x380   : > { %v2031_v36 = vadd.f32 %v4381_v48, %v1995_v25  ;;  %v1966_v52 = vmul.f32 %v4363_v24, %v1863_v30  ;;  %2851 = vrot.lane.b32.xlu1 %v4208_v22, %s3788_s4  ;;  %v1682_v5 = vpop.permute.xlu0 %1681  ;;  %v2454_v25 = vld [vmem:[%s4833_s1 + $0xd0] sm:$0xff]  ;;  %v2455_v30 = vld [vmem:[%s4833_s1 + $0xd8] sm:$0xff]  ;;  %3638 = vmatprep.subr.bf16.mxu0 %v3637_v51 }
 0x381   : > { %2857 = vrot.lane.b32.xlu0 %v4235_v7, %s3788_s4  ;;  %v1803_v63 = vmul.f32 %v4367_v27, %v1682_v5  ;;  %v3641_v39 = vpack.c.bf16 %v2454_v25, %v2453_v49  ;;  %3653 = vmatprep.subr.bf16.mxu1 %v3637_v51 }
 0x382   : > { %v2063_v45 = vmax.f32 %v2031_v36, 0.0  ;;  %v1998_v43 = vadd.f32 %v1966_v52, %v1802_v40  ;;  %v2456_v36 = vld [vmem:[%s4833_s1 + $0xe0] sm:$0xff]  ;;  %3640 = vmatpush3.bf16.msra.mxu0 %v3637_v51  ;;  %3657 = vmatpush3.bf16.msra.mxu1 %v3637_v51 }
 0x383   : > { %v1859_v50 = vpop.permute.xlu1 %1858  ;;  %3642 = vmatprep.subr.bf16.mxu0 %v3641_v39  ;;  %3654 = vmatprep.subr.bf16.mxu1 %v3641_v39 }
 0x384   : > { %v1965_v37 = vmul.f32 %v4363_v24, %v1859_v50  ;;  %2855 = vrot.lane.b32.xlu1 %v4220_v42, %s3788_s4  ;;  %3502 = vmatprep.mubr.msk.f32.mxu1 %vm1017_vm1, %v2063_v45  ;;  %v1697_v22 = vpop.permute.xlu0 %1696  ;;  %v2034_v57 = vadd.f32 %v4381_v48, %v1998_v43  ;;  %v3645_v43 = vpack.c.bf16 %v2456_v36, %v2455_v30 }
 0x385   : > { %2861 = vrot.lane.b32.xlu0 %v4247_v26, %s3788_s4  ;;  %3503 = vmatmul.mubr.msk.f32.gmra.mrb[38].mxu1 %vm1017_vm1, %v2064_v41  ;;  %v1806_v12 = vmul.f32 %v4367_v27, %v1697_v22 }
 0x386   : > { %v1997_v7 = vadd.f32 %v1965_v37, %v1801_v55  ;;  %v2066_v47 = vmax.f32 %v2034_v57, 0.0  ;;  %3644 = vmatpush3.bf16.msra.mxu0 %v3641_v39  ;;  %3658 = vmatpush3.bf16.msra.mxu1 %v3641_v39 }
 0x387   : > { %v1871_v3 = vpop.permute.xlu1 %1870  ;;  %3646 = vmatprep.subr.bf16.mxu0 %v3645_v43  ;;  %3655 = vmatprep.subr.bf16.mxu1 %v3645_v43 }
 0x388   : > { %v2033_v58 = vadd.f32 %v4381_v48, %v1997_v7  ;;  %v1968_v59 = vmul.f32 %v4363_v24, %v1871_v3  ;;  %2859 = vrot.lane.b32.xlu1 %v4232_v1, %s3788_s4  ;;  %v1692_v42 = vpop.permute.xlu0 %1691 }
 0x389   : > { %2865 = vrot.lane.b32.xlu0 %v4259_v56, %s3788_s4  ;;  %v1805_v19 = vmul.f32 %v4367_v27, %v1692_v42 }
 0x38a   : > { %v2065_v26 = vmax.f32 %v2033_v58, 0.0  ;;  %v2000_v18 = vadd.f32 %v1968_v59, %v1804_v61  ;;  %3648 = vmatpush3.bf16.msra.mxu0 %v3645_v43  ;;  %3659 = vmatpush3.bf16.msra.mxu1 %v3645_v43 }
 0x38b   : > { %v1867_v60 = vpop.permute.xlu1 %1866 }
 0x38c   : > { %v1967_v2 = vmul.f32 %v4363_v24, %v1867_v60  ;;  %2863 = vrot.lane.b32.xlu1 %v4244_v21, %s3788_s4  ;;  %3505 = vmatprep.mubr.msk.f32.mxu1 %vm1017_vm1, %v2065_v26  ;;  %v1707_v1 = vpop.permute.xlu0 %1706  ;;  %v2036_v8 = vadd.f32 %v4381_v48, %v2000_v18 }
 0x38d   : > { %2869 = vrot.lane.b32.xlu0 %v4271_v13, %s3788_s4  ;;  %3506 = vmatmul.mubr.msk.f32.gmra.mrb[40].mxu1 %vm1017_vm1, %v2066_v47  ;;  %v1808_v32 = vmul.f32 %v4367_v27, %v1707_v1 }
 0x38e   : > { %v1999_v56 = vadd.f32 %v1967_v2, %v1803_v63  ;;  %v2068_v14 = vmax.f32 %v2036_v8, 0.0 }
 0x38f   : > { %v1879_v0 = vpop.permute.xlu1 %1878 }
 0x390   : > { %v2035_v11 = vadd.f32 %v4381_v48, %v1999_v56  ;;  %v1970_v34 = vmul.f32 %v4363_v24, %v1879_v0  ;;  %2867 = vrot.lane.b32.xlu1 %v4256_v44, %s3788_s4  ;;  %v1702_v21 = vpop.permute.xlu0 %1701 }
 0x391   : > { %2873 = vrot.lane.b32.xlu0 %v4283_v38, %s3788_s4 }
 0x392   : > { %v2067_v13 = vmax.f32 %v2035_v11, 0.0  ;;  %v2002_v16 = vadd.f32 %v1970_v34, %v1806_v12 }
 0x393   : > { %v1875_v17 = vpop.permute.xlu1 %1874 }
 0x394   : > { %v1969_v15 = vmul.f32 %v4363_v24, %v1875_v17  ;;  %2871 = vrot.lane.b32.xlu1 %v4268_v10, %s3788_s4  ;;  %3508 = vmatprep.mubr.msk.f32.mxu1 %vm1017_vm1, %v2067_v13  ;;  %v1717_v44 = vpop.permute.xlu0 %1716  ;;  %v2038_v53 = vadd.f32 %v4381_v48, %v2002_v16 }
 0x395   : > { %2877 = vrot.lane.b32.xlu0 %v4295_v4, %s3788_s4  ;;  %3509 = vmatmul.mubr.msk.f32.gmra.mrb[42].mxu1 %vm1017_vm1, %v2068_v14  ;;  %v1810_v50 = vmul.f32 %v4367_v27, %v1717_v44 }
 0x396   : > { %v2001_v38 = vadd.f32 %v1969_v15, %v1805_v19  ;;  %v2070_v29 = vmax.f32 %v2038_v53, 0.0 }
 0x397   : > { %v1887_v20 = vpop.permute.xlu1 %1886 }
 0x398   : > { %v2037_v23 = vadd.f32 %v4381_v48, %v2001_v38  ;;  %v1972_v28 = vmul.f32 %v4363_v24, %v1887_v20  ;;  %2875 = vrot.lane.b32.xlu1 %v4280_v33, %s3788_s4  ;;  %v1712_v10 = vpop.permute.xlu0 %1711  ;;  %v1807_v33 = vmul.f32 %v4367_v27, %v1702_v21 }
 0x399   : > { %v1809_v57 = vmul.f32 %v4367_v27, %v1712_v10 }
 0x39a   : > { %v2069_v31 = vmax.f32 %v2037_v23, 0.0  ;;  %v2004_v9 = vadd.f32 %v1972_v28, %v1808_v32 }
 0x39b   : > { %v1883_v4 = vpop.permute.xlu1 %1882 }
 0x39c   : > { %v1971_v35 = vmul.f32 %v4363_v24, %v1883_v4  ;;  %2879 = vrot.lane.b32.xlu1 %v4292_v62, %s3788_s4  ;;  %3511 = vmatprep.mubr.msk.f32.mxu1 %vm1017_vm1, %v2069_v31  ;;  %v1727_v46 = vpop.permute.xlu0 %1726  ;;  %v2040_v52 = vadd.f32 %v4381_v48, %v2004_v9 }
 0x39d   : > { %3512 = vmatmul.mubr.msk.f32.gmra.mrb[44].mxu1 %vm1017_vm1, %v2070_v29  ;;  %v1812_v60 = vmul.f32 %v4367_v27, %v1727_v46 }
 0x39e   : > { %v2003_v62 = vadd.f32 %v1971_v35, %v1807_v33  ;;  %v2072_v37 = vmax.f32 %v2040_v52, 0.0  ;;  %v2457_v52 = vld [vmem:[%s4833_s1 + $0xe8] sm:$0xff] }
 0x39f   : > { %v1895_v5 = vpop.permute.xlu1 %1894 }
 0x3a0   : > { %v2039_v40 = vadd.f32 %v4381_v48, %v2003_v62  ;;  %v1974_v45 = vmul.f32 %v4363_v24, %v1895_v5  ;;  %v1722_v41 = vpop.permute.xlu0 %1721  ;;  %v2458_v5 = vld [vmem:[%s4833_s1 + $0xf0] sm:$0xff] }
 0x3a1   : > { %v1811_v8 = vmul.f32 %v4367_v27, %v1722_v41 }
 0x3a2   : > { %v2071_v55 = vmax.f32 %v2039_v40, 0.0  ;;  %v2006_v22 = vadd.f32 %v1974_v45, %v1810_v50  ;;  %v3649_v45 = vpack.c.bf16 %v2458_v5, %v2457_v52 }
 0x3a3   : > { %v1891_v7 = vpop.permute.xlu1 %1890 }
 0x3a4   : > { %v1973_v3 = vmul.f32 %v4363_v24, %v1891_v7  ;;  %3514 = vmatprep.mubr.msk.f32.mxu1 %vm1017_vm1, %v2071_v55  ;;  %v1737_v58 = vpop.permute.xlu0 %1736  ;;  %v2042_v42 = vadd.f32 %v4381_v48, %v2006_v22  ;;  %3650 = vmatprep.subr.bf16.mxu0 %v3649_v45 }
 0x3a5   : > { %3515 = vmatmul.mubr.msk.f32.gmra.mrb[46].mxu1 %vm1017_vm1, %v2072_v37  ;;  %v1814_v17 = vmul.f32 %v4367_v27, %v1737_v58  ;;  %3656 = vmatprep.subr.bf16.mxu1 %v3649_v45 }
 0x3a6   : > { %v2005_v59 = vadd.f32 %v1973_v3, %v1809_v57  ;;  %v2074_v2 = vmax.f32 %v2042_v42, 0.0  ;;  %3652 = vmatpush3.bf16.msra.mxu0 %v3649_v45  ;;  %3660 = vmatpush3.bf16.msra.mxu1 %v3649_v45 }
 0x3a7   : > { %v1903_v61 = vpop.permute.xlu1 %1902 }
 0x3a8   : > { %v2041_v26 = vadd.f32 %v4381_v48, %v2005_v59  ;;  %v1976_v47 = vmul.f32 %v4363_v24, %v1903_v61  ;;  %v1732_v18 = vpop.permute.xlu0 %1731 }
 0x3a9   : > { %v1813_v53 = vmul.f32 %v4367_v27, %v1732_v18 }
 0x3aa   : > { %v2073_v63 = vmax.f32 %v2041_v26, 0.0  ;;  %v2008_v1 = vadd.f32 %v1976_v47, %v1812_v60 }
 0x3ab   : > { %v1899_v56 = vpop.permute.xlu1 %1898 }
 0x3ac   : > { %v1975_v0 = vmul.f32 %v4363_v24, %v1899_v56  ;;  %3517 = vmatprep.mubr.msk.f32.mxu1 %vm1017_vm1, %v2073_v63  ;;  %v1747_v11 = vpop.permute.xlu0 %1746  ;;  %v2044_v21 = vadd.f32 %v4381_v48, %v2008_v1 }
 0x3ad   : > { %3518 = vmatmul.mubr.msk.f32.gmra.mrb[48].mxu1 %vm1017_vm1, %v2074_v2  ;;  %v1816_v4 = vmul.f32 %v4367_v27, %v1747_v11 }
 0x3ae   : > { %v2007_v34 = vadd.f32 %v1975_v0, %v1811_v8  ;;  %v2076_v15 = vmax.f32 %v2044_v21, 0.0 }
 0x3af   : > { %v1911_v12 = vpop.permute.xlu1 %1910 }
 0x3b0   : > { %v2043_v13 = vadd.f32 %v4381_v48, %v2007_v34  ;;  %v1978_v14 = vmul.f32 %v4363_v24, %v1911_v12  ;;  %v1742_v16 = vpop.permute.xlu0 %1741 }
 0x3b1   : > { %v1815_v35 = vmul.f32 %v4367_v27, %v1742_v16 }
 0x3b2   : > { %v2075_v19 = vmax.f32 %v2043_v13, 0.0  ;;  %v2010_v44 = vadd.f32 %v1978_v14, %v1814_v17 }
 0x3b3   : > { %v1907_v38 = vpop.permute.xlu1 %1906 }
 0x3b4   : > { %v1977_v20 = vmul.f32 %v4363_v24, %v1907_v38  ;;  %3520 = vmatprep.mubr.msk.f32.mxu1 %vm1017_vm1, %v2075_v19  ;;  %v1757_v23 = vpop.permute.xlu0 %1756  ;;  %v2046_v10 = vadd.f32 %v4381_v48, %v2010_v44 }
 0x3b5   : > { %3521 = vmatmul.mubr.msk.f32.gmra.mrb[50].mxu1 %vm1017_vm1, %v2076_v15  ;;  %v1818_v40 = vmul.f32 %v4367_v27, %v1757_v23 }
 0x3b6   : > { %v2009_v28 = vadd.f32 %v1977_v20, %v1813_v53  ;;  %v2078_v54 = vmax.f32 %v2046_v10, 0.0 }
 0x3b7   : > { %v1919_v32 = vpop.permute.xlu1 %1918 }
 0x3b8   : > { %v2045_v31 = vadd.f32 %v4381_v48, %v2009_v28  ;;  %v1980_v29 = vmul.f32 %v4363_v24, %v1919_v32  ;;  %v1752_v9 = vpop.permute.xlu0 %1751 }
 0x3b9   : > { %v1817_v22 = vmul.f32 %v4367_v27, %v1752_v9 }
 0x3ba   : > { %v2077_v6 = vmax.f32 %v2045_v31, 0.0  ;;  %v2012_v49 = vadd.f32 %v1980_v29, %v1816_v4 }
 0x3bb   : > { %v1915_v33 = vpop.permute.xlu1 %1914 }
 0x3bc   : > { %v1979_v46 = vmul.f32 %v4363_v24, %v1915_v33  ;;  %3523 = vmatprep.mubr.msk.f32.mxu1 %vm1017_vm1, %v2077_v6  ;;  %v1767_v51 = vpop.permute.xlu0 %1766  ;;  %v2048_v39 = vadd.f32 %v4381_v48, %v2012_v49 }
 0x3bd   : > { %3524 = vmatmul.mubr.msk.f32.gmra.mrb[52].mxu1 %vm1017_vm1, %v2078_v54  ;;  %v1820_v61 = vmul.f32 %v4367_v27, %v1767_v51 }
 0x3be   : > { %v2011_v25 = vadd.f32 %v1979_v46, %v1815_v35  ;;  %v2080_v43 = vmax.f32 %v2048_v39, 0.0 }
 0x3bf   : > { %v1927_v30 = vpop.permute.xlu1 %1926 }
 0x3c0   : > { %v2047_v36 = vadd.f32 %v4381_v48, %v2011_v25  ;;  %v1982_v62 = vmul.f32 %v4363_v24, %v1927_v30  ;;  %v1762_v55 = vpop.permute.xlu0 %1761 }
 0x3c1   : > { %v1819_v2 = vmul.f32 %v4367_v27, %v1762_v55 }
 0x3c2   : > { %v2079_v41 = vmax.f32 %v2047_v36, 0.0  ;;  %v2014_v50 = vadd.f32 %v1982_v62, %v1818_v40 }
 0x3c3   : > { %v1923_v37 = vpop.permute.xlu1 %1922 }
 0x3c4   : > { %v1981_v7 = vmul.f32 %v4363_v24, %v1923_v37  ;;  %3526 = vmatprep.mubr.msk.f32.mxu1 %vm1017_vm1, %v2079_v41  ;;  %v2050_v3 = vadd.f32 %v4381_v48, %v2014_v50  ;;  %v1777_v26 = vpop.permute.xlu0 %1776 }
 0x3c5   : > { %3527 = vmatmul.mubr.msk.f32.gmra.mrb[54].mxu1 %vm1017_vm1, %v2080_v43  ;;  %v1822_v12 = vmul.f32 %v4367_v27, %v1777_v26 }
 0x3c6   : > { %v2013_v57 = vadd.f32 %v1981_v7, %v1817_v22  ;;  %v2082_v18 = vmax.f32 %v2050_v3, 0.0 }
 0x3c7   : > { %v1935_v58 = vpop.permute.xlu1 %1934 }
 0x3c8   : > { %v2049_v59 = vadd.f32 %v4381_v48, %v2013_v57  ;;  %v1984_v42 = vmul.f32 %v4363_v24, %v1935_v58  ;;  %v1772_v0 = vpop.permute.xlu0 %1771 }
 0x3c9   : > { %v1821_v15 = vmul.f32 %v4367_v27, %v1772_v0 }
 0x3ca   : > { %v2081_v47 = vmax.f32 %v2049_v59, 0.0  ;;  %v2016_v60 = vadd.f32 %v1984_v42, %v1820_v61 }
 0x3cb   : > { %v1931_v63 = vpop.permute.xlu1 %1930 }
 0x3cc   : > { %v1983_v1 = vmul.f32 %v4363_v24, %v1931_v63  ;;  %3529 = vmatprep.mubr.msk.f32.mxu1 %vm1017_vm1, %v2081_v47  ;;  %v2052_v8 = vadd.f32 %v4381_v48, %v2016_v60 }
 0x3cd   : > { %3530 = vmatmul.mubr.msk.f32.gmra.mrb[56].mxu1 %vm1017_vm1, %v2082_v18 }
 0x3ce   : > { %v2015_v56 = vadd.f32 %v1983_v1, %v1819_v2  ;;  %v2084_v14 = vmax.f32 %v2052_v8, 0.0 }
 0x3cf   : > { %v1943_v11 = vpop.permute.xlu1 %1942 }
 0x3d0   : > { %v2051_v34 = vadd.f32 %v4381_v48, %v2015_v56  ;;  %v1986_v21 = vmul.f32 %v4363_v24, %v1943_v11  ;;  %v1782_v17 = vpop.permute.xlu0 %1781 }
 0x3d1   : > { %v1823_v23 = vmul.f32 %v4367_v27, %v1782_v17 }
 0x3d2   : > { %v2083_v13 = vmax.f32 %v2051_v34, 0.0  ;;  %v2018_v16 = vadd.f32 %v1986_v21, %v1822_v12 }
 0x3d3   : > { %v1939_v19 = vpop.permute.xlu1 %1938 }
 0x3d4   : > { %v1985_v44 = vmul.f32 %v4363_v24, %v1939_v19  ;;  %3532 = vmatprep.mubr.msk.f32.mxu1 %vm1017_vm1, %v2083_v13  ;;  %v2054_v53 = vadd.f32 %v4381_v48, %v2018_v16  ;;  %v1787_v32 = vpop.permute.xlu0 %1786 }
 0x3d5   : > { %3533 = vmatmul.mubr.msk.f32.gmra.mrb[58].mxu1 %vm1017_vm1, %v2084_v14  ;;  %v1824_v6 = vmul.f32 %v4367_v27, %v1787_v32  ;;  %v4591_v27 = vld [vmem:[%s4833_s1 + $0xb0] ss:$0 sm:$0xff] }
 0x3d6   : > { %v2017_v38 = vadd.f32 %v1985_v44, %v1821_v15  ;;  %v2086_v9 = vmax.f32 %v2054_v53, 0.0 }
 0x3d7   : > { %v1947_v20 = vpop.permute.xlu1 %1946 }
 0x3d8   : > { %v2053_v28 = vadd.f32 %v4381_v48, %v2017_v38  ;;  %v1987_v10 = vmul.f32 %v4363_v24, %v1947_v20 }
 0x3da   : > { %v2085_v31 = vmax.f32 %v2053_v28, 0.0  ;;  %v2019_v29 = vadd.f32 %v1987_v10, %v1823_v23 }
 0x3db   : > { %v1951_v4 = vpop.permute.xlu1 %1950 }
 0x3dc   : > { %v2055_v54 = vadd.f32 %v4381_v48, %v2019_v29  ;;  %v1988_v49 = vmul.f32 %v4363_v24, %v1951_v4  ;;  %3535 = vmatprep.mubr.msk.f32.mxu1 %vm1017_vm1, %v2085_v31 }
 0x3dd   : > { %3536 = vmatmul.mubr.msk.f32.gmra.mrb[60].mxu1 %vm1017_vm1, %v2086_v9 }
 0x3de   : > { %v2087_v33 = vmax.f32 %v2055_v54, 0.0  ;;  %v2020_v35 = vadd.f32 %v1988_v49, %v1824_v6 }
 0x3e0   : > { %v2056_v46 = vadd.f32 %v4381_v48, %v2020_v35  ;;  %3538 = vmatprep.mubr.msk.f32.mxu1 %vm1017_vm1, %v2087_v33 }
 0x3e2   : > { %v2088_v51 = vmax.f32 %v2056_v46, 0.0 }
 0x3e4   : > { %3539 = vmatmul.mubr.msk.f32.gmra.mrb[62].mxu1 %vm1017_vm1, %v2088_v51 }
 0x440   : > { %v3495_v25 = vpop.f32.mrb[32].mxu1 }
 0x441   : > { %v2266_v24 = vadd.f32 %v3495_v25, %v4591_v27  ;;  %v2260_v39 = vpop.f32.mrb[33].mxu1 }
 0x442   : > { %v2261_v30 = vadd.f32 %v4591_v27, %v2260_v39 }
 0x443   : > { %v2420_v62 = vmax.f32 %v2266_v24, 0.0 }
 0x444   : > { %v2419_v36 = vmax.f32 %v2261_v30, 0.0 }
 0x446   : > { %3557 = vmatprep.mubr.msk.f32.mxu0 %vm654_vm0, %v2419_v36 }
 0x447   : > { %3558 = vmatmul.mubr.msk.f32.vlgmr.msra.gmra.mrb[32].mxu0 %vm654_vm0, %v2420_v62 }
 0x448   : > { %v3498_v48 = vpop.f32.mrb[34].mxu1 }
 0x449   : > { %v2276_v52 = vadd.f32 %v3498_v48, %v4591_v27  ;;  %v2270_v5 = vpop.f32.mrb[35].mxu1 }
 0x44a   : > { %v2271_v40 = vadd.f32 %v4591_v27, %v2270_v5 }
 0x44b   : > { %v2422_v41 = vmax.f32 %v2276_v52, 0.0 }
 0x44c   : > { %v2421_v45 = vmax.f32 %v2271_v40, 0.0 }
 0x44e   : > { %3560 = vmatprep.mubr.msk.f32.mxu0 %vm654_vm0, %v2421_v45 }
 0x44f   : > { %3561 = vmatmul.mubr.msk.f32.gmra.mrb[34].mxu0 %vm654_vm0, %v2422_v41 }
 0x450   : > { %v3501_v43 = vpop.f32.mrb[36].mxu1 }
 0x451   : > { %v2286_v50 = vadd.f32 %v3501_v43, %v4591_v27  ;;  %v2280_v55 = vpop.f32.mrb[37].mxu1 }
 0x452   : > { %v2281_v37 = vadd.f32 %v4591_v27, %v2280_v55 }
 0x453   : > { %v2424_v7 = vmax.f32 %v2286_v50, 0.0 }
 0x454   : > { %v2423_v22 = vmax.f32 %v2281_v37, 0.0 }
 0x456   : > { %3563 = vmatprep.mubr.msk.f32.mxu0 %vm654_vm0, %v2423_v22 }
 0x457   : > { %3564 = vmatmul.mubr.msk.f32.gmra.mrb[36].mxu0 %vm654_vm0, %v2424_v7 }
 0x458   : > { %v3504_v57 = vpop.f32.mrb[38].mxu1 }
 0x459   : > { %v2296_v3 = vadd.f32 %v3504_v57, %v4591_v27  ;;  %v2290_v58 = vpop.f32.mrb[39].mxu1 }
 0x45a   : > { %v2291_v59 = vadd.f32 %v4591_v27, %v2290_v58 }
 0x45b   : > { %v2426_v61 = vmax.f32 %v2296_v3, 0.0 }
 0x45c   : > { %v2425_v42 = vmax.f32 %v2291_v59, 0.0 }
 0x45e   : > { %3566 = vmatprep.mubr.msk.f32.mxu0 %vm654_vm0, %v2425_v42 }
 0x45f   : > { %3567 = vmatmul.mubr.msk.f32.gmra.mrb[38].mxu0 %vm654_vm0, %v2426_v61 }
 0x460   : > { %v3507_v26 = vpop.f32.mrb[40].mxu1 }
 0x461   : > { %v2306_v47 = vadd.f32 %v3507_v26, %v4591_v27  ;;  %v2300_v18 = vpop.f32.mrb[41].mxu1 }
 0x462   : > { %v2301_v60 = vadd.f32 %v4591_v27, %v2300_v18 }
 0x463   : > { %v2428_v2 = vmax.f32 %v2306_v47, 0.0 }
 0x464   : > { %v2427_v63 = vmax.f32 %v2301_v60, 0.0 }
 0x466   : > { %3569 = vmatprep.mubr.msk.f32.mxu0 %vm654_vm0, %v2427_v63 }
 0x467   : > { %3570 = vmatmul.mubr.msk.f32.gmra.mrb[40].mxu0 %vm654_vm0, %v2428_v2 }
 0x468   : > { %v3510_v1 = vpop.f32.mrb[42].mxu1 }
 0x469   : > { %v2316_v56 = vadd.f32 %v3510_v1, %v4591_v27  ;;  %v2310_v8 = vpop.f32.mrb[43].mxu1 }
 0x46a   : > { %v2311_v0 = vadd.f32 %v4591_v27, %v2310_v8 }
 0x46b   : > { %v2430_v34 = vmax.f32 %v2316_v56, 0.0 }
 0x46c   : > { %v2429_v11 = vmax.f32 %v2311_v0, 0.0  ;;  %v4660_v0 = vld [vmem:[%s4833_s1 + $0xf8] ss:$0 sm:$0xff] }
 0x46e   : > { %3572 = vmatprep.mubr.msk.f32.mxu0 %vm654_vm0, %v2429_v11 }
 0x46f   : > { %3573 = vmatmul.mubr.msk.f32.gmra.mrb[42].mxu0 %vm654_vm0, %v2430_v34 }
 0x470   : > { %v3513_v21 = vpop.f32.mrb[44].mxu1 }
 0x471   : > { %v2326_v12 = vadd.f32 %v3513_v21, %v4591_v27  ;;  %v2320_v13 = vpop.f32.mrb[45].mxu1 }
 0x472   : > { %v2321_v14 = vadd.f32 %v4591_v27, %v2320_v13  ;;  %v2818_v13 = vpop.permute.xlu0 %2817 }
 0x473   : > { %v2432_v17 = vmax.f32 %v2326_v12, 0.0 }
 0x474   : > { %v2431_v16 = vmax.f32 %v2321_v14, 0.0 }
 0x476   : > { %3575 = vmatprep.mubr.msk.f32.mxu0 %vm654_vm0, %v2431_v16 }
 0x477   : > { %3576 = vmatmul.mubr.msk.f32.gmra.mrb[44].mxu0 %vm654_vm0, %v2432_v17 }
 0x478   : > { %v3516_v19 = vpop.f32.mrb[46].mxu1 }
 0x479   : > { %v2336_v15 = vadd.f32 %v3516_v19, %v4591_v27  ;;  %v2330_v44 = vpop.f32.mrb[47].mxu1 }
 0x47a   : > { %v2331_v38 = vadd.f32 %v4591_v27, %v2330_v44 }
 0x47b   : > { %v2434_v20 = vmax.f32 %v2336_v15, 0.0 }
 0x47c   : > { %v2433_v53 = vmax.f32 %v2331_v38, 0.0 }
 0x47e   : > { %3578 = vmatprep.mubr.msk.f32.mxu0 %vm654_vm0, %v2433_v53 }
 0x47f   : > { %3579 = vmatmul.mubr.msk.f32.gmra.mrb[46].mxu0 %vm654_vm0, %v2434_v20 }
 0x480   : > { %v3519_v23 = vpop.f32.mrb[48].mxu1 }
 0x481   : > { %v2346_v28 = vadd.f32 %v3519_v23, %v4591_v27  ;;  %v2340_v10 = vpop.f32.mrb[49].mxu1  ;;  %v2822_v23 = vpop.permute.xlu0 %2821 }
 0x482   : > { %v2341_v32 = vadd.f32 %v4591_v27, %v2340_v10 }
 0x483   : > { %v2436_v29 = vmax.f32 %v2346_v28, 0.0 }
 0x484   : > { %v2435_v31 = vmax.f32 %v2341_v32, 0.0 }
 0x486   : > { %3581 = vmatprep.mubr.msk.f32.mxu0 %vm654_vm0, %v2435_v31 }
 0x487   : > { %3582 = vmatmul.mubr.msk.f32.gmra.mrb[48].mxu0 %vm654_vm0, %v2436_v29 }
 0x488   : > { %v3522_v9 = vpop.f32.mrb[50].mxu1 }
 0x489   : > { %v2356_v4 = vadd.f32 %v3522_v9, %v4591_v27  ;;  %v2350_v6 = vpop.f32.mrb[51].mxu1 }
 0x48a   : > { %v2351_v54 = vadd.f32 %v4591_v27, %v2350_v6 }
 0x48b   : > { %v2438_v33 = vmax.f32 %v2356_v4, 0.0 }
 0x48c   : > { %v2437_v49 = vmax.f32 %v2351_v54, 0.0 }
 0x48e   : > { %3584 = vmatprep.mubr.msk.f32.mxu0 %vm654_vm0, %v2437_v49  ;;  %v2826_v49 = vpop.permute.xlu0 %2825 }
 0x48f   : > { %3585 = vmatmul.mubr.msk.f32.gmra.mrb[50].mxu0 %vm654_vm0, %v2438_v33 }
 0x490   : > { %v3525_v35 = vpop.f32.mrb[52].mxu1 }
 0x491   : > { %v2366_v46 = vadd.f32 %v3525_v35, %v4591_v27  ;;  %v2360_v51 = vpop.f32.mrb[53].mxu1 }
 0x492   : > { %v2361_v25 = vadd.f32 %v4591_v27, %v2360_v51 }
 0x493   : > { %v2440_v39 = vmax.f32 %v2366_v46, 0.0 }
 0x494   : > { %v2439_v24 = vmax.f32 %v2361_v25, 0.0 }
 0x496   : > { %3587 = vmatprep.mubr.msk.f32.mxu0 %vm654_vm0, %v2439_v24 }
 0x497   : > { %3588 = vmatmul.mubr.msk.f32.gmra.mrb[52].mxu0 %vm654_vm0, %v2440_v39 }
 0x498   : > { %v3528_v30 = vpop.f32.mrb[54].mxu1 }
 0x499   : > { %v2376_v36 = vadd.f32 %v3528_v30, %v4591_v27  ;;  %v2370_v62 = vpop.f32.mrb[55].mxu1 }
 0x49a   : > { %v2371_v48 = vadd.f32 %v4591_v27, %v2370_v62  ;;  %v2830_v62 = vpop.permute.xlu0 %2829 }
 0x49b   : > { %v2442_v5 = vmax.f32 %v2376_v36, 0.0 }
 0x49c   : > { %v2441_v52 = vmax.f32 %v2371_v48, 0.0 }
 0x49e   : > { %3590 = vmatprep.mubr.msk.f32.mxu0 %vm654_vm0, %v2441_v52 }
 0x49f   : > { %3591 = vmatmul.mubr.msk.f32.gmra.mrb[54].mxu0 %vm654_vm0, %v2442_v5 }
 0x4a0   : > { %v3531_v40 = vpop.f32.mrb[56].mxu1 }
 0x4a1   : > { %v2386_v45 = vadd.f32 %v3531_v40, %v4591_v27  ;;  %v2380_v41 = vpop.f32.mrb[57].mxu1 }
 0x4a2   : > { %v2381_v43 = vadd.f32 %v4591_v27, %v2380_v41 }
 0x4a3   : > { %v2444_v55 = vmax.f32 %v2386_v45, 0.0 }
 0x4a4   : > { %v2443_v50 = vmax.f32 %v2381_v43, 0.0 }
 0x4a6   : > { %3593 = vmatprep.mubr.msk.f32.mxu0 %vm654_vm0, %v2443_v50 }
 0x4a7   : > { %3594 = vmatmul.mubr.msk.f32.gmra.mrb[56].mxu0 %vm654_vm0, %v2444_v55 }
 0x4a8   : > { %v3534_v37 = vpop.f32.mrb[58].mxu1 }
 0x4a9   : > { %v2396_v22 = vadd.f32 %v3534_v37, %v4591_v27  ;;  %v2390_v7 = vpop.f32.mrb[59].mxu1  ;;  %v2834_v37 = vpop.permute.xlu0 %2833 }
 0x4aa   : > { %v2391_v57 = vadd.f32 %v4591_v27, %v2390_v7 }
 0x4ab   : > { %v2446_v58 = vmax.f32 %v2396_v22, 0.0 }
 0x4ac   : > { %v2445_v3 = vmax.f32 %v2391_v57, 0.0 }
 0x4ae   : > { %3596 = vmatprep.mubr.msk.f32.mxu0 %vm654_vm0, %v2445_v3 }
 0x4af   : > { %3597 = vmatmul.mubr.msk.f32.gmra.mrb[58].mxu0 %vm654_vm0, %v2446_v58 }
 0x4b0   : > { %v3537_v59 = vpop.f32.mrb[60].mxu1 }
 0x4b1   : > { %v2406_v42 = vadd.f32 %v3537_v59, %v4591_v27  ;;  %v2400_v61 = vpop.f32.mrb[61].mxu1 }
 0x4b2   : > { %v2401_v26 = vadd.f32 %v4591_v27, %v2400_v61 }
 0x4b3   : > { %v2448_v18 = vmax.f32 %v2406_v42, 0.0 }
 0x4b4   : > { %v2447_v47 = vmax.f32 %v2401_v26, 0.0 }
 0x4b6   : > { %3599 = vmatprep.mubr.msk.f32.mxu0 %vm654_vm0, %v2447_v47  ;;  %v2838_v47 = vpop.permute.xlu0 %2837 }
 0x4b7   : > { %v3540_v60 = vpop.f32.mrb[62].mxu1  ;;  %3600 = vmatmul.mubr.msk.f32.gmra.mrb[60].mxu0 %vm654_vm0, %v2448_v18 }
 0x4b8   : > { %v2416_v63 = vadd.f32 %v3540_v60, %v4591_v27  ;;  %v2410_v2 = vpop.f32.mrb[63].mxu1 }
 0x4b9   : > { %v2411_v1 = vadd.f32 %v4591_v27, %v2410_v2  ;;  %v2820_v27 = vpop.permute.xlu1 %2819 }
 0x4ba   : > { %v2450_v8 = vmax.f32 %v2416_v63, 0.0 }
 0x4bb   : > { %v2449_v56 = vmax.f32 %v2411_v1, 0.0 }
 0x4bd   : > { %3602 = vmatprep.mubr.msk.f32.mxu1 %vm654_vm0, %v2449_v56  ;;  %v2824_v53 = vpop.permute.xlu1 %2823 }
 0x4be   : > { %3603 = vmatmul.mubr.msk.f32.vlgmr.msra.gmra.mrb[64].mxu1 %vm654_vm0, %v2450_v8 }
 0x4c1   : > { %v2828_v6 = vpop.permute.xlu1 %2827 }
 0x4c5   : > { %v2832_v30 = vpop.permute.xlu1 %2831 }
 0x4c9   : > { %v2836_v50 = vpop.permute.xlu1 %2835 }
 0x4cd   : > { %v2840_v61 = vpop.permute.xlu1 %2839 }
 0x51a   : > { %v3559_v11 = vpop.f32.mrb[32].mxu0 }
 0x51b   : > { %v2632_v34 = vadd.f32 %v3559_v11, %v4660_v0  ;;  %v2626_v21 = vpop.f32.mrb[33].mxu0  ;;  %v2844_v11 = vpop.permute.xlu1 %2843 }
 0x51c   : > { %v2627_v12 = vadd.f32 %v4660_v0, %v2626_v21  ;;  %v2842_v21 = vpop.permute.xlu0 %2841 }
 0x51d   : > { %v2915_v14 = vsel %vm2913_vm2, %v2632_v34, %v2820_v27 }
 0x51e   : > { %v2948_v16 = vsel %vm2946_vm3, %v2915_v14, %v2820_v27  ;;  %v2914_v17 = vsel %vm2913_vm2, %v2627_v12, %v2818_v13 }
 0x51f   : > { %2981 = vst.msk [vmem:[%s4668_s6 + $0x8] sm:$0xff] %vm2979_vm4, %v2948_v16  ;;  %v2947_v19 = vsel %vm2946_vm3, %v2914_v17, %v2818_v13 }
 0x520   : > { %2980 = vst.msk [vmem:[%s4668_s6] sm:$0xff] %vm2979_vm4, %v2947_v19 }
 0x522   : > { %v3562_v15 = vpop.f32.mrb[34].mxu0 }
 0x523   : > { %v2642_v44 = vadd.f32 %v3562_v15, %v4660_v0  ;;  %v2636_v38 = vpop.f32.mrb[35].mxu0  ;;  %v2848_v15 = vpop.permute.xlu1 %2847 }
 0x524   : > { %v2637_v20 = vadd.f32 %v4660_v0, %v2636_v38  ;;  %v2846_v38 = vpop.permute.xlu0 %2845 }
 0x525   : > { %v2917_v28 = vsel %vm2913_vm2, %v2642_v44, %v2824_v53 }
 0x526   : > { %v2950_v10 = vsel %vm2946_vm3, %v2917_v28, %v2824_v53  ;;  %v2916_v32 = vsel %vm2913_vm2, %v2637_v20, %v2822_v23 }
 0x527   : > { %2983 = vst.msk [vmem:[%s4668_s6 + $0x18] sm:$0xff] %vm2979_vm4, %v2950_v10  ;;  %v2949_v31 = vsel %vm2946_vm3, %v2916_v32, %v2822_v23 }
 0x528   : > { %2982 = vst.msk [vmem:[%s4668_s6 + $0x10] sm:$0xff] %vm2979_vm4, %v2949_v31 }
 0x52a   : > { %v3565_v29 = vpop.f32.mrb[36].mxu0 }
 0x52b   : > { %v2652_v9 = vadd.f32 %v3565_v29, %v4660_v0  ;;  %v2646_v4 = vpop.f32.mrb[37].mxu0  ;;  %v2852_v29 = vpop.permute.xlu1 %2851 }
 0x52c   : > { %v2647_v54 = vadd.f32 %v4660_v0, %v2646_v4  ;;  %v2850_v4 = vpop.permute.xlu0 %2849 }
 0x52d   : > { %v2919_v33 = vsel %vm2913_vm2, %v2652_v9, %v2828_v6 }
 0x52e   : > { %v2952_v35 = vsel %vm2946_vm3, %v2919_v33, %v2828_v6  ;;  %v2918_v46 = vsel %vm2913_vm2, %v2647_v54, %v2826_v49 }
 0x52f   : > { %2985 = vst.msk [vmem:[%s4668_s6 + $0x28] sm:$0xff] %vm2979_vm4, %v2952_v35  ;;  %v2951_v51 = vsel %vm2946_vm3, %v2918_v46, %v2826_v49 }
 0x530   : > { %2984 = vst.msk [vmem:[%s4668_s6 + $0x20] sm:$0xff] %vm2979_vm4, %v2951_v51 }
 0x532   : > { %v3568_v25 = vpop.f32.mrb[38].mxu0 }
 0x533   : > { %v2662_v24 = vadd.f32 %v3568_v25, %v4660_v0  ;;  %v2656_v39 = vpop.f32.mrb[39].mxu0  ;;  %v2856_v25 = vpop.permute.xlu1 %2855 }
 0x534   : > { %v2657_v36 = vadd.f32 %v4660_v0, %v2656_v39  ;;  %v2854_v39 = vpop.permute.xlu0 %2853 }
 0x535   : > { %v2921_v48 = vsel %vm2913_vm2, %v2662_v24, %v2832_v30 }
 0x536   : > { %v2954_v52 = vsel %vm2946_vm3, %v2921_v48, %v2832_v30  ;;  %v2920_v5 = vsel %vm2913_vm2, %v2657_v36, %v2830_v62 }
 0x537   : > { %2987 = vst.msk [vmem:[%s4668_s6 + $0x38] sm:$0xff] %vm2979_vm4, %v2954_v52  ;;  %v2953_v40 = vsel %vm2946_vm3, %v2920_v5, %v2830_v62 }
 0x538   : > { %2986 = vst.msk [vmem:[%s4668_s6 + $0x30] sm:$0xff] %vm2979_vm4, %v2953_v40 }
 0x53a   : > { %v3571_v45 = vpop.f32.mrb[40].mxu0 }
 0x53b   : > { %v2672_v41 = vadd.f32 %v3571_v45, %v4660_v0  ;;  %v2666_v43 = vpop.f32.mrb[41].mxu0  ;;  %v2860_v45 = vpop.permute.xlu1 %2859 }
 0x53c   : > { %v2667_v55 = vadd.f32 %v4660_v0, %v2666_v43  ;;  %v2858_v43 = vpop.permute.xlu0 %2857 }
 0x53d   : > { %v2923_v22 = vsel %vm2913_vm2, %v2672_v41, %v2836_v50 }
 0x53e   : > { %v2956_v7 = vsel %vm2946_vm3, %v2923_v22, %v2836_v50  ;;  %v2922_v57 = vsel %vm2913_vm2, %v2667_v55, %v2834_v37 }
 0x53f   : > { %2989 = vst.msk [vmem:[%s4668_s6 + $0x48] sm:$0xff] %vm2979_vm4, %v2956_v7  ;;  %v2955_v3 = vsel %vm2946_vm3, %v2922_v57, %v2834_v37 }
 0x540   : > { %2988 = vst.msk [vmem:[%s4668_s6 + $0x40] sm:$0xff] %vm2979_vm4, %v2955_v3 }
 0x542   : > { %v3574_v58 = vpop.f32.mrb[42].mxu0 }
 0x543   : > { %v2682_v59 = vadd.f32 %v3574_v58, %v4660_v0  ;;  %v2676_v42 = vpop.f32.mrb[43].mxu0  ;;  %v2864_v58 = vpop.permute.xlu1 %2863 }
 0x544   : > { %v2677_v26 = vadd.f32 %v4660_v0, %v2676_v42  ;;  %v2862_v42 = vpop.permute.xlu0 %2861 }
 0x545   : > { %v2925_v18 = vsel %vm2913_vm2, %v2682_v59, %v2840_v61 }
 0x546   : > { %v2958_v60 = vsel %vm2946_vm3, %v2925_v18, %v2840_v61  ;;  %v2924_v63 = vsel %vm2913_vm2, %v2677_v26, %v2838_v47 }
 0x547   : > { %2991 = vst.msk [vmem:[%s4668_s6 + $0x58] sm:$0xff] %vm2979_vm4, %v2958_v60  ;;  %v2957_v2 = vsel %vm2946_vm3, %v2924_v63, %v2838_v47 }
 0x548   : > { %2990 = vst.msk [vmem:[%s4668_s6 + $0x50] sm:$0xff] %vm2979_vm4, %v2957_v2 }
 0x54a   : > { %v3577_v1 = vpop.f32.mrb[44].mxu0 }
 0x54b   : > { %v2692_v56 = vadd.f32 %v3577_v1, %v4660_v0  ;;  %v2686_v8 = vpop.f32.mrb[45].mxu0  ;;  %v2868_v1 = vpop.permute.xlu1 %2867 }
 0x54c   : > { %v2687_v34 = vadd.f32 %v4660_v0, %v2686_v8  ;;  %v2866_v8 = vpop.permute.xlu0 %2865 }
 0x54d   : > { %v2927_v27 = vsel %vm2913_vm2, %v2692_v56, %v2844_v11 }
 0x54e   : > { %v2960_v12 = vsel %vm2946_vm3, %v2927_v27, %v2844_v11  ;;  %v2926_v13 = vsel %vm2913_vm2, %v2687_v34, %v2842_v21 }
 0x54f   : > { %2993 = vst.msk [vmem:[%s4668_s6 + $0x68] sm:$0xff] %vm2979_vm4, %v2960_v12  ;;  %v2959_v14 = vsel %vm2946_vm3, %v2926_v13, %v2842_v21 }
 0x550   : > { %2992 = vst.msk [vmem:[%s4668_s6 + $0x60] sm:$0xff] %vm2979_vm4, %v2959_v14 }
 0x552   : > { %v3580_v16 = vpop.f32.mrb[46].mxu0 }
 0x553   : > { %v2702_v17 = vadd.f32 %v3580_v16, %v4660_v0  ;;  %v2696_v19 = vpop.f32.mrb[47].mxu0  ;;  %v2872_v16 = vpop.permute.xlu1 %2871 }
 0x554   : > { %v2697_v44 = vadd.f32 %v4660_v0, %v2696_v19  ;;  %v2870_v19 = vpop.permute.xlu0 %2869 }
 0x555   : > { %v2929_v53 = vsel %vm2913_vm2, %v2702_v17, %v2848_v15 }
 0x556   : > { %v2962_v20 = vsel %vm2946_vm3, %v2929_v53, %v2848_v15  ;;  %v2928_v23 = vsel %vm2913_vm2, %v2697_v44, %v2846_v38 }
 0x557   : > { %2995 = vst.msk [vmem:[%s4668_s6 + $0x78] sm:$0xff] %vm2979_vm4, %v2962_v20  ;;  %v2961_v28 = vsel %vm2946_vm3, %v2928_v23, %v2846_v38 }
 0x558   : > { %2994 = vst.msk [vmem:[%s4668_s6 + $0x70] sm:$0xff] %vm2979_vm4, %v2961_v28 }
 0x55a   : > { %v3583_v10 = vpop.f32.mrb[48].mxu0 }
 0x55b   : > { %v2712_v32 = vadd.f32 %v3583_v10, %v4660_v0  ;;  %v2706_v31 = vpop.f32.mrb[49].mxu0  ;;  %v2876_v10 = vpop.permute.xlu1 %2875 }
 0x55c   : > { %v2707_v9 = vadd.f32 %v4660_v0, %v2706_v31  ;;  %v2874_v31 = vpop.permute.xlu0 %2873 }
 0x55d   : > { %v2931_v6 = vsel %vm2913_vm2, %v2712_v32, %v2852_v29 }
 0x55e   : > { %v2964_v54 = vsel %vm2946_vm3, %v2931_v6, %v2852_v29  ;;  %v2930_v49 = vsel %vm2913_vm2, %v2707_v9, %v2850_v4 }
 0x55f   : > { %2997 = vst.msk [vmem:[%s4668_s6 + $0x88] sm:$0xff] %vm2979_vm4, %v2964_v54  ;;  %v2963_v33 = vsel %vm2946_vm3, %v2930_v49, %v2850_v4 }
 0x560   : > { %2996 = vst.msk [vmem:[%s4668_s6 + $0x80] sm:$0xff] %vm2979_vm4, %v2963_v33 }
 0x562   : > { %v3586_v35 = vpop.f32.mrb[50].mxu0 }
 0x563   : > { %v2722_v46 = vadd.f32 %v3586_v35, %v4660_v0  ;;  %v2716_v51 = vpop.f32.mrb[51].mxu0  ;;  %v2880_v35 = vpop.permute.xlu1 %2879 }
 0x564   : > { %v2717_v24 = vadd.f32 %v4660_v0, %v2716_v51  ;;  %v2878_v51 = vpop.permute.xlu0 %2877 }
 0x565   : > { %v2933_v30 = vsel %vm2913_vm2, %v2722_v46, %v2856_v25 }
 0x566   : > { %v2966_v36 = vsel %vm2946_vm3, %v2933_v30, %v2856_v25  ;;  %v2932_v62 = vsel %vm2913_vm2, %v2717_v24, %v2854_v39 }
 0x567   : > { %2999 = vst.msk [vmem:[%s4668_s6 + $0x98] sm:$0xff] %vm2979_vm4, %v2966_v36  ;;  %v2965_v48 = vsel %vm2946_vm3, %v2932_v62, %v2854_v39 }
 0x568   : > { %2998 = vst.msk [vmem:[%s4668_s6 + $0x90] sm:$0xff] %vm2979_vm4, %v2965_v48 }
 0x56a   : > { %v3589_v52 = vpop.f32.mrb[52].mxu0 }
 0x56b   : > { %v2732_v5 = vadd.f32 %v3589_v52, %v4660_v0  ;;  %v2726_v40 = vpop.f32.mrb[53].mxu0 }
 0x56c   : > { %v2727_v41 = vadd.f32 %v4660_v0, %v2726_v40 }
 0x56d   : > { %v2935_v50 = vsel %vm2913_vm2, %v2732_v5, %v2860_v45 }
 0x56e   : > { %v2968_v55 = vsel %vm2946_vm3, %v2935_v50, %v2860_v45  ;;  %v2934_v37 = vsel %vm2913_vm2, %v2727_v41, %v2858_v43 }
 0x56f   : > { %3001 = vst.msk [vmem:[%s4668_s6 + $0xa8] sm:$0xff] %vm2979_vm4, %v2968_v55  ;;  %v2967_v22 = vsel %vm2946_vm3, %v2934_v37, %v2858_v43 }
 0x570   : > { %3000 = vst.msk [vmem:[%s4668_s6 + $0xa0] sm:$0xff] %vm2979_vm4, %v2967_v22 }
 0x572   : > { %v3592_v7 = vpop.f32.mrb[54].mxu0 }
 0x573   : > { %v2742_v57 = vadd.f32 %v3592_v7, %v4660_v0  ;;  %v2736_v3 = vpop.f32.mrb[55].mxu0 }
 0x574   : > { %v2737_v59 = vadd.f32 %v4660_v0, %v2736_v3 }
 0x575   : > { %v2937_v61 = vsel %vm2913_vm2, %v2742_v57, %v2864_v58 }
 0x576   : > { %v2970_v26 = vsel %vm2946_vm3, %v2937_v61, %v2864_v58  ;;  %v2936_v47 = vsel %vm2913_vm2, %v2737_v59, %v2862_v42 }
 0x577   : > { %3003 = vst.msk [vmem:[%s4668_s6 + $0xb8] sm:$0xff] %vm2979_vm4, %v2970_v26  ;;  %v2969_v18 = vsel %vm2946_vm3, %v2936_v47, %v2862_v42 }
 0x578   : > { %3002 = vst.msk [vmem:[%s4668_s6 + $0xb0] sm:$0xff] %vm2979_vm4, %v2969_v18 }
 0x57a   : > { %v3595_v60 = vpop.f32.mrb[56].mxu0 }
 0x57b   : > { %v2752_v63 = vadd.f32 %v3595_v60, %v4660_v0  ;;  %v2746_v2 = vpop.f32.mrb[57].mxu0 }
 0x57c   : > { %v2747_v56 = vadd.f32 %v4660_v0, %v2746_v2 }
 0x57d   : > { %v2939_v11 = vsel %vm2913_vm2, %v2752_v63, %v2868_v1 }
 0x57e   : > { %v2972_v34 = vsel %vm2946_vm3, %v2939_v11, %v2868_v1  ;;  %v2938_v21 = vsel %vm2913_vm2, %v2747_v56, %v2866_v8 }
 0x57f   : > { %3005 = vst.msk [vmem:[%s4668_s6 + $0xc8] sm:$0xff] %vm2979_vm4, %v2972_v34  ;;  %v2971_v27 = vsel %vm2946_vm3, %v2938_v21, %v2866_v8 }
 0x580   : > { %3004 = vst.msk [vmem:[%s4668_s6 + $0xc0] sm:$0xff] %vm2979_vm4, %v2971_v27 }
 0x582   : > { %v3598_v12 = vpop.f32.mrb[58].mxu0 }
 0x583   : > { %v2762_v13 = vadd.f32 %v3598_v12, %v4660_v0  ;;  %v2756_v14 = vpop.f32.mrb[59].mxu0 }
 0x584   : > { %v2757_v17 = vadd.f32 %v4660_v0, %v2756_v14 }
 0x585   : > { %v2941_v15 = vsel %vm2913_vm2, %v2762_v13, %v2872_v16 }
 0x586   : > { %v2974_v44 = vsel %vm2946_vm3, %v2941_v15, %v2872_v16  ;;  %v2940_v38 = vsel %vm2913_vm2, %v2757_v17, %v2870_v19 }
 0x587   : > { %3007 = vst.msk [vmem:[%s4668_s6 + $0xd8] sm:$0xff] %vm2979_vm4, %v2974_v44  ;;  %v2973_v53 = vsel %vm2946_vm3, %v2940_v38, %v2870_v19 }
 0x588   : > { %3006 = vst.msk [vmem:[%s4668_s6 + $0xd0] sm:$0xff] %vm2979_vm4, %v2973_v53 }
 0x58a   : > { %v3601_v20 = vpop.f32.mrb[60].mxu0 }
 0x58b   : > { %v2772_v23 = vadd.f32 %v3601_v20, %v4660_v0  ;;  %v2766_v28 = vpop.f32.mrb[61].mxu0 }
 0x58c   : > { %v2767_v32 = vadd.f32 %v4660_v0, %v2766_v28 }
 0x58d   : > { %v2943_v29 = vsel %vm2913_vm2, %v2772_v23, %v2876_v10 }
 0x58e   : > { %v2976_v9 = vsel %vm2946_vm3, %v2943_v29, %v2876_v10  ;;  %v2942_v4 = vsel %vm2913_vm2, %v2767_v32, %v2874_v31 }
 0x58f   : > { %3009 = vst.msk [vmem:[%s4668_s6 + $0xe8] sm:$0xff] %vm2979_vm4, %v2976_v9  ;;  %v2975_v6 = vsel %vm2946_vm3, %v2942_v4, %v2874_v31 }
 0x590   : > { %3008 = vst.msk [vmem:[%s4668_s6 + $0xe0] sm:$0xff] %vm2979_vm4, %v2975_v6 }
 0x591   : > { %v3604_v54 = vpop.f32.mrb[64].mxu1 }
 0x592   : > { %v2782_v49 = vadd.f32 %v3604_v54, %v4660_v0  ;;  %v2776_v33 = vpop.f32.mrb[65].mxu1 }
 0x593   : > { %v2777_v46 = vadd.f32 %v4660_v0, %v2776_v33 }
 0x594   : > { %v2945_v25 = vsel %vm2913_vm2, %v2782_v49, %v2880_v35 }
 0x595   : > { %v2978_v24 = vsel %vm2946_vm3, %v2945_v25, %v2880_v35  ;;  %v2944_v39 = vsel %vm2913_vm2, %v2777_v46, %v2878_v51 }
 0x596   : > { %3011 = vst.msk [vmem:[%s4668_s6 + $0xf8] sm:$0xff] %vm2979_vm4, %v2978_v24  ;;  %v2977_v30 = vsel %vm2946_vm3, %v2944_v39, %v2878_v51 }
 0x597   : > { %3010 = vst.msk [vmem:[%s4668_s6 + $0xf0] sm:$0xff] %vm2979_vm4, %v2977_v30 }
 0x598 PF: > { %s12_s9 = sadd.s32 1, %s3783_s9  }
 0x599   : > { %p9_p4 = scmp.ge.s32.totalorder %s12_s9, 4  }
 0x59b   :  { %11 = sbr.rel (!%p9_p4) target bundleno = 1 (0x1), region = 58 }

</bundles_post_ra>
